<compile_context>
chip_gen: v7x
topology: tpu7x:2x2x1
jax: 0.10.0
libtpu: 0.0.40
codegen_flags: <defaults>
</compile_context>

<pallas_src>
import functools
import math

import jax
import jax.numpy as jnp
import numpy as np
from jax import lax
from jax.experimental import pallas as pl
from jax.experimental.pallas import tpu as pltpu

HIDDEN = 256
_ROW_BLOCK_TARGET = 1024  # target rows (M) of the (B*T, C) matmuls per grid step


def _round_up(n, m):
    return -(-n // m) * m


def _cdiv(a, b):
    return -(-a // b)


def _rows_per_block(seq_len, total_rows, target=_ROW_BLOCK_TARGET):
    """Rows per grid step: a multiple of seq_len (whole batches per block, so
    the conv roll never crosses a block boundary) and of 16 (bf16 sublane
    tile), close to `target`.  Keeps the grid >= 2 steps when there is enough
    work so v7x's two TensorCores can both be used."""
    unit = seq_len * 16 // math.gcd(seq_len, 16)        # lcm(T, 16)
    total_units = _cdiv(total_rows, unit)
    units = max(1, min(max(1, target // unit), total_units))
    if total_units >= 2:
        units = min(units, _cdiv(total_units, 2))       # grid >= 2 (megacore/v7x)
    return unit * units


def _tcn_kernel(x_ref, w0_ref, b0_ref, w1_ref, b1_ref, w2_ref, b2_ref,
                w3_ref, b3_ref, wf_ref, bf_ref, o_ref, *, seq_len):
    m = x_ref.shape[0]                                   # rows in this block

    # initial_fc: bf16 (M, F) @ bf16 (F, 256) -> f32 acc, + f32 bias.
    h = jnp.dot(x_ref[...], w0_ref[...],
                preferred_element_type=jnp.float32) + b0_ref[...]

    # Batch-boundary masks, hoisted once, built narrow ((m, 1)) and broadcast.
    t_idx = lax.broadcasted_iota(jnp.int32, (m, 1), 0) % seq_len
    first_row = t_idx == 0                               # t == 0 within a batch
    last_row = t_idx == seq_len - 1                      # t == T-1 within a batch

    def conv_relu(h, w_ref, b_ref):
        # Conv1d(k=3, pad=1) along time == three accumulating K=256 MXU dots
        # (bf16 operands, f32 accumulation).  The row-wise boundary mask
        # commutes with the matmul, so roll/mask act on the per-tap products;
        # no (M, 3C) concat is ever materialized.
        hb = h.astype(jnp.bfloat16)
        p_prev = jnp.dot(hb, w_ref[0], preferred_element_type=jnp.float32)
        p_mid = jnp.dot(hb, w_ref[1], preferred_element_type=jnp.float32)
        p_next = jnp.dot(hb, w_ref[2], preferred_element_type=jnp.float32)
        y = (p_mid
             + jnp.where(first_row, 0.0, pltpu.roll(p_prev, shift=1, axis=0))
             + jnp.where(last_row, 0.0, pltpu.roll(p_next, shift=m - 1, axis=0))
             + b_ref[...])
        return jnp.maximum(y, 0.0)

    h = conv_relu(h, w1_ref, b1_ref)
    h = conv_relu(h, w2_ref, b2_ref)
    h = conv_relu(h, w3_ref, b3_ref)

    # final_fc: (1, 256) . (M, 256)^T -> lane-dense (1, M) output row
    # (negligible FLOPs; avoids last-dim-1 masked stores).
    out_row = lax.dot_general(wf_ref[...], h, (((1,), (1,)), ((), ())),
                              preferred_element_type=jnp.float32)
    o_ref[0] = (out_row + bf_ref[0, 0]).astype(o_ref.dtype)


def doppler_crowd_tcn(x, params):
    """x: (B, T, R, D). Returns (B, T) float32 (bf16 matmuls, f32 accumulation)."""
    (w0, b0, w1, b1, w2, b2, w3, b3, wf, bf) = params
    B, T, R, D = x.shape
    F = R * D
    rows = B * T

    m = _rows_per_block(T, rows)
    # Whole batches per block (roll/mask correctness) and bf16 sublane tiling.
    assert m % T == 0 and m % 16 == 0, (m, T)
    padded_rows = _round_up(rows, m)
    grid = padded_rows // m

    # bf16 operands for the MXU; padded rows never leak into real rows (the
    # conv roll is masked at every (row % T) boundary, padded outputs sliced).
    x_rows = x.reshape(rows, F).astype(jnp.bfloat16)
    if padded_rows != rows:
        x_rows = jnp.pad(x_rows, ((0, padded_rows - rows), (0, 0)))

    bf16 = lambda a: a.astype(jnp.bfloat16)
    f32 = lambda a: a.astype(jnp.float32)
    const = lambda shape: pl.BlockSpec(shape, lambda g: (0,) * len(shape))

    out = pl.pallas_call(
        functools.partial(_tcn_kernel, seq_len=T),
        out_shape=jax.ShapeDtypeStruct((grid, 1, m), jnp.float32),
        grid_spec=pltpu.PrefetchScalarGridSpec(
            num_scalar_prefetch=0,
            grid=(grid,),
            in_specs=[
                pl.BlockSpec((m, F), lambda g: (g, 0)),                # x rows (bf16)
                const((F, HIDDEN)), const((1, HIDDEN)),                # initial fc
                const((3, HIDDEN, HIDDEN)), const((1, HIDDEN)),        # conv1 taps
                const((3, HIDDEN, HIDDEN)), const((1, HIDDEN)),        # conv2 taps
                const((3, HIDDEN, HIDDEN)), const((1, HIDDEN)),        # conv3 taps
                const((1, HIDDEN)),                                    # final fc weight
                pl.BlockSpec(memory_space=pltpu.MemorySpace.SMEM),     # final fc bias
            ],
            out_specs=pl.BlockSpec((1, 1, m), lambda g: (g, 0, 0)),
        ),
        compiler_params=pltpu.CompilerParams(
            dimension_semantics=("parallel",),
            vmem_limit_bytes=64 * 1024 * 1024),
    )(x_rows, bf16(w0), f32(b0), bf16(w1), f32(b1), bf16(w2), f32(b2),
      bf16(w3), f32(b3), f32(wf), f32(bf))

    return out.reshape(padded_rows)[:rows].reshape(B, T)


def init_params(key, input_channels):
    """Deterministic synthetic parameters (shapes match the nn.Module).

    Mapping from torch:
      initial_fc.weight (256, F)   -> w0 = weight.T                       (F, 256)
      conv.weight (Cout, Cin, 3)   -> w[k] = weight[:, :, k].T       (3, 256, 256)
      final_fc.weight (1, 256)     -> wf                                  (1, 256)
    """
    ks = jax.random.split(key, 10)
    s = 0.05
    w0 = s * jax.random.normal(ks[0], (input_channels, HIDDEN), jnp.float32)
    b0 = s * jax.random.normal(ks[1], (1, HIDDEN), jnp.float32)
    w1 = s * jax.random.normal(ks[2], (3, HIDDEN, HIDDEN), jnp.float32)
    b1 = s * jax.random.normal(ks[3], (1, HIDDEN), jnp.float32)
    w2 = s * jax.random.normal(ks[4], (3, HIDDEN, HIDDEN), jnp.float32)
    b2 = s * jax.random.normal(ks[5], (1, HIDDEN), jnp.float32)
    w3 = s * jax.random.normal(ks[6], (3, HIDDEN, HIDDEN), jnp.float32)
    b3 = s * jax.random.normal(ks[7], (1, HIDDEN), jnp.float32)
    wf = s * jax.random.normal(ks[8], (1, HIDDEN), jnp.float32)
    bf = s * jax.random.normal(ks[9], (1, 1), jnp.float32)
    return (w0, b0, w1, b1, w2, b2, w3, b3, wf, bf)


def reference_forward(x, params):
    """Pure-JAX reference with matching precision policy (bf16 matmul operands,
    f32 accumulation) and identical conv/fc semantics, for correctness check."""
    (w0, b0, w1, b1, w2, b2, w3, b3, wf, bf) = params
    B, T, R, D = x.shape
    xb = x.reshape(B, T, R * D).astype(jnp.bfloat16)
    h = jnp.dot(xb, w0.astype(jnp.bfloat16),
                preferred_element_type=jnp.float32) + b0[0]
    for w, b in ((w1, b1), (w2, b2), (w3, b3)):
        wb = w.astype(jnp.bfloat16)
        hp = jnp.pad(h.astype(jnp.bfloat16), ((0, 0), (1, 1), (0, 0)))
        y = (jnp.dot(hp[:, :-2], wb[0], preferred_element_type=jnp.float32)
             + jnp.dot(hp[:, 1:-1], wb[1], preferred_element_type=jnp.float32)
             + jnp.dot(hp[:, 2:], wb[2], preferred_element_type=jnp.float32)
             + b[0])
        h = jnp.maximum(y, 0.0)
    return jnp.einsum('btc,c->bt', h, wf[0]) + bf[0, 0]


if __name__ == "__main__":
    # Small shapes consistent with the module (range/doppler bins are ctor args).
    B, T, range_bins, doppler_bins = 2, 8, 8, 4
    key = jax.random.PRNGKey(0)
    kx, kp = jax.random.split(key)

    x = jax.random.normal(kx, (B, T, range_bins, doppler_bins), jnp.float32)
    params = init_params(kp, range_bins * doppler_bins)

    out = jax.block_until_ready(doppler_crowd_tcn(x, params))
    ref = jax.block_until_ready(reference_forward(x, params))

    assert out.shape == (B, T), out.shape
    np.testing.assert_allclose(np.asarray(out), np.asarray(ref),
                               rtol=2e-3, atol=2e-3)
    print("KERNEL_OK")
</pallas_src>

<mosaic_0001>
module attributes {stable_mosaic.version = 11 : i64} {
  func.func @_tcn_kernel(%arg0: i32, %arg1: memref<16x32xbf16, #tpu.memory_space<vmem>>, %arg2: memref<32x256xbf16, #tpu.memory_space<vmem>>, %arg3: memref<1x256xf32, #tpu.memory_space<vmem>>, %arg4: memref<3x256x256xbf16, #tpu.memory_space<vmem>>, %arg5: memref<1x256xf32, #tpu.memory_space<vmem>>, %arg6: memref<3x256x256xbf16, #tpu.memory_space<vmem>>, %arg7: memref<1x256xf32, #tpu.memory_space<vmem>>, %arg8: memref<3x256x256xbf16, #tpu.memory_space<vmem>>, %arg9: memref<1x256xf32, #tpu.memory_space<vmem>>, %arg10: memref<1x256xf32, #tpu.memory_space<vmem>>, %arg11: memref<1x1xf32, #tpu.memory_space<smem>>, %arg12: memref<1x1x16xf32, #tpu.memory_space<vmem>>) attributes {dimension_semantics = [#tpu.dimension_semantics<parallel>], iteration_bounds = array<i64: 1>, scalar_prefetch = 0 : i64, scratch_operands = 0 : i64, tpu.core_type = #tpu.core_type<tc>, window_params = [{transform_indices = @transform_0, window_bounds = array<i64: 16, 32>}, {pipeline_mode = #tpu.pipeline_mode<synchronous>, transform_indices = @transform_1, window_bounds = array<i64: 32, 256>}, {pipeline_mode = #tpu.pipeline_mode<synchronous>, transform_indices = @transform_2, window_bounds = array<i64: 1, 256>}, {pipeline_mode = #tpu.pipeline_mode<synchronous>, transform_indices = @transform_3, window_bounds = array<i64: 3, 256, 256>}, {pipeline_mode = #tpu.pipeline_mode<synchronous>, transform_indices = @transform_4, window_bounds = array<i64: 1, 256>}, {pipeline_mode = #tpu.pipeline_mode<synchronous>, transform_indices = @transform_5, window_bounds = array<i64: 3, 256, 256>}, {pipeline_mode = #tpu.pipeline_mode<synchronous>, transform_indices = @transform_6, window_bounds = array<i64: 1, 256>}, {pipeline_mode = #tpu.pipeline_mode<synchronous>, transform_indices = @transform_7, window_bounds = array<i64: 3, 256, 256>}, {pipeline_mode = #tpu.pipeline_mode<synchronous>, transform_indices = @transform_8, window_bounds = array<i64: 1, 256>}, {pipeline_mode = #tpu.pipeline_mode<synchronous>, transform_indices = @transform_9, window_bounds = array<i64: 1, 256>}, {transform_indices = @transform_10, window_bounds = array<i64: 1, 1>}, {transform_indices = @transform_11, window_bounds = array<i64: 1, 1, 16>}]} {
    %c0 = arith.constant 0 : index
    %c0_0 = arith.constant 0 : index
    %0 = vector.load %arg1[%c0, %c0_0] : memref<16x32xbf16, #tpu.memory_space<vmem>>, vector<16x32xbf16>
    %c0_1 = arith.constant 0 : index
    %c0_2 = arith.constant 0 : index
    %1 = vector.load %arg2[%c0_1, %c0_2] : memref<32x256xbf16, #tpu.memory_space<vmem>>, vector<32x256xbf16>
    %cst = arith.constant dense<0.000000e+00> : vector<16x256xf32>
    %2 = tpu.matmul %0, %1, %cst {dimension_numbers = #tpu.dot_dimension_numbers<[1], [0], [0], [1], [0, 0, 1, 1], [], []>} : vector<16x32xbf16>, vector<32x256xbf16>, vector<16x256xf32> -> vector<16x256xf32>
    %c0_3 = arith.constant 0 : index
    %c0_4 = arith.constant 0 : index
    %3 = vector.load %arg3[%c0_3, %c0_4] : memref<1x256xf32, #tpu.memory_space<vmem>>, vector<1x256xf32>
    %4 = vector.broadcast %3 : vector<1x256xf32> to vector<16x256xf32>
    %5 = arith.addf %2, %4 : vector<16x256xf32>
    %6 = tpu.iota {dimensions = array<i32: 0>} : vector<16x1xi32>
    %c8_i32 = arith.constant 8 : i32
    %c0_i32 = arith.constant 0 : i32
    %7 = arith.cmpi eq, %c8_i32, %c0_i32 : i32
    %c1_i32 = arith.constant 1 : i32
    %8 = arith.select %7, %c1_i32, %c8_i32 : i32
    %9 = vector.broadcast %8 : i32 to vector<16x1xi32>
    %10 = arith.remsi %6, %9 : vector<16x1xi32>
    %c0_i32_5 = arith.constant 0 : i32
    %11 = vector.broadcast %c0_i32_5 : i32 to vector<16x1xi32>
    %12 = arith.cmpi ne, %10, %11 : vector<16x1xi32>
    %c0_i32_6 = arith.constant 0 : i32
    %13 = vector.broadcast %c0_i32_6 : i32 to vector<16x1xi32>
    %14 = arith.cmpi slt, %10, %13 : vector<16x1xi32>
    %c0_i32_7 = arith.constant 0 : i32
    %15 = arith.cmpi slt, %8, %c0_i32_7 : i32
    %16 = vector.broadcast %15 : i1 to vector<16x1xi1>
    %17 = vector.broadcast %16 : vector<16x1xi1> to vector<16x1xi1>
    %18 = arith.xori %14, %17 : vector<16x1xi1>
    %19 = arith.andi %18, %12 : vector<16x1xi1>
    %20 = vector.broadcast %8 : i32 to vector<16x1xi32>
    %21 = arith.addi %10, %20 : vector<16x1xi32>
    %22 = arith.select %19, %21, %10 : vector<16x1xi1>, vector<16x1xi32>
    %c0_i32_8 = arith.constant 0 : i32
    %23 = vector.broadcast %c0_i32_8 : i32 to vector<16x1xi32>
    %24 = arith.cmpi eq, %22, %23 : vector<16x1xi32>
    %c7_i32 = arith.constant 7 : i32
    %25 = vector.broadcast %c7_i32 : i32 to vector<16x1xi32>
    %26 = arith.cmpi eq, %22, %25 : vector<16x1xi32>
    %27 = arith.truncf %5 : vector<16x256xf32> to vector<16x256xbf16>
    %c0_9 = arith.constant 0 : index
    %c0_10 = arith.constant 0 : index
    %c0_11 = arith.constant 0 : index
    %28 = vector.load %arg4[%c0_9, %c0_10, %c0_11] : memref<3x256x256xbf16, #tpu.memory_space<vmem>>, vector<1x256x256xbf16>
    %29 = vector.shape_cast %28 : vector<1x256x256xbf16> to vector<256x256xbf16>
    %cst_12 = arith.constant dense<0.000000e+00> : vector<16x256xf32>
    %30 = tpu.matmul %27, %29, %cst_12 {dimension_numbers = #tpu.dot_dimension_numbers<[1], [0], [0], [1], [0, 0, 1, 1], [], []>} : vector<16x256xbf16>, vector<256x256xbf16>, vector<16x256xf32> -> vector<16x256xf32>
    %c1 = arith.constant 1 : index
    %c0_13 = arith.constant 0 : index
    %c0_14 = arith.constant 0 : index
    %31 = vector.load %arg4[%c1, %c0_13, %c0_14] : memref<3x256x256xbf16, #tpu.memory_space<vmem>>, vector<1x256x256xbf16>
    %32 = vector.shape_cast %31 : vector<1x256x256xbf16> to vector<256x256xbf16>
    %cst_15 = arith.constant dense<0.000000e+00> : vector<16x256xf32>
    %33 = tpu.matmul %27, %32, %cst_15 {dimension_numbers = #tpu.dot_dimension_numbers<[1], [0], [0], [1], [0, 0, 1, 1], [], []>} : vector<16x256xbf16>, vector<256x256xbf16>, vector<16x256xf32> -> vector<16x256xf32>
    %c2 = arith.constant 2 : index
    %c0_16 = arith.constant 0 : index
    %c0_17 = arith.constant 0 : index
    %34 = vector.load %arg4[%c2, %c0_16, %c0_17] : memref<3x256x256xbf16, #tpu.memory_space<vmem>>, vector<1x256x256xbf16>
    %35 = vector.shape_cast %34 : vector<1x256x256xbf16> to vector<256x256xbf16>
    %cst_18 = arith.constant dense<0.000000e+00> : vector<16x256xf32>
    %36 = tpu.matmul %27, %35, %cst_18 {dimension_numbers = #tpu.dot_dimension_numbers<[1], [0], [0], [1], [0, 0, 1, 1], [], []>} : vector<16x256xbf16>, vector<256x256xbf16>, vector<16x256xf32> -> vector<16x256xf32>
    %c1_i32_19 = arith.constant 1 : i32
    %37 = tpu.dynamic_rotate %30 by %c1_i32_19 dim 0 : vector<16x256xf32>, i32 -> vector<16x256xf32>
    %cst_20 = arith.constant 0.000000e+00 : f32
    %38 = vector.shape_cast %24 : vector<16x1xi1> to vector<16x1xi1>
    %39 = vector.broadcast %38 : vector<16x1xi1> to vector<16x256xi1>
    %40 = vector.broadcast %cst_20 : f32 to vector<16x256xf32>
    %41 = arith.select %39, %40, %37 : vector<16x256xi1>, vector<16x256xf32>
    %42 = arith.addf %33, %41 : vector<16x256xf32>
    %c15_i32 = arith.constant 15 : i32
    %43 = tpu.dynamic_rotate %36 by %c15_i32 dim 0 : vector<16x256xf32>, i32 -> vector<16x256xf32>
    %cst_21 = arith.constant 0.000000e+00 : f32
    %44 = vector.shape_cast %26 : vector<16x1xi1> to vector<16x1xi1>
    %45 = vector.broadcast %44 : vector<16x1xi1> to vector<16x256xi1>
    %46 = vector.broadcast %cst_21 : f32 to vector<16x256xf32>
    %47 = arith.select %45, %46, %43 : vector<16x256xi1>, vector<16x256xf32>
    %48 = arith.addf %42, %47 : vector<16x256xf32>
    %c0_22 = arith.constant 0 : index
    %c0_23 = arith.constant 0 : index
    %49 = vector.load %arg5[%c0_22, %c0_23] : memref<1x256xf32, #tpu.memory_space<vmem>>, vector<1x256xf32>
    %50 = vector.broadcast %49 : vector<1x256xf32> to vector<16x256xf32>
    %51 = arith.addf %48, %50 : vector<16x256xf32>
    %cst_24 = arith.constant 0.000000e+00 : f32
    %52 = vector.broadcast %cst_24 : f32 to vector<16x256xf32>
    %53 = arith.maximumf %51, %52 : vector<16x256xf32>
    %54 = arith.truncf %53 : vector<16x256xf32> to vector<16x256xbf16>
    %c0_25 = arith.constant 0 : index
    %c0_26 = arith.constant 0 : index
    %c0_27 = arith.constant 0 : index
    %55 = vector.load %arg6[%c0_25, %c0_26, %c0_27] : memref<3x256x256xbf16, #tpu.memory_space<vmem>>, vector<1x256x256xbf16>
    %56 = vector.shape_cast %55 : vector<1x256x256xbf16> to vector<256x256xbf16>
    %cst_28 = arith.constant dense<0.000000e+00> : vector<16x256xf32>
    %57 = tpu.matmul %54, %56, %cst_28 {dimension_numbers = #tpu.dot_dimension_numbers<[1], [0], [0], [1], [0, 0, 1, 1], [], []>} : vector<16x256xbf16>, vector<256x256xbf16>, vector<16x256xf32> -> vector<16x256xf32>
    %c1_29 = arith.constant 1 : index
    %c0_30 = arith.constant 0 : index
    %c0_31 = arith.constant 0 : index
    %58 = vector.load %arg6[%c1_29, %c0_30, %c0_31] : memref<3x256x256xbf16, #tpu.memory_space<vmem>>, vector<1x256x256xbf16>
    %59 = vector.shape_cast %58 : vector<1x256x256xbf16> to vector<256x256xbf16>
    %cst_32 = arith.constant dense<0.000000e+00> : vector<16x256xf32>
    %60 = tpu.matmul %54, %59, %cst_32 {dimension_numbers = #tpu.dot_dimension_numbers<[1], [0], [0], [1], [0, 0, 1, 1], [], []>} : vector<16x256xbf16>, vector<256x256xbf16>, vector<16x256xf32> -> vector<16x256xf32>
    %c2_33 = arith.constant 2 : index
    %c0_34 = arith.constant 0 : index
    %c0_35 = arith.constant 0 : index
    %61 = vector.load %arg6[%c2_33, %c0_34, %c0_35] : memref<3x256x256xbf16, #tpu.memory_space<vmem>>, vector<1x256x256xbf16>
    %62 = vector.shape_cast %61 : vector<1x256x256xbf16> to vector<256x256xbf16>
    %cst_36 = arith.constant dense<0.000000e+00> : vector<16x256xf32>
    %63 = tpu.matmul %54, %62, %cst_36 {dimension_numbers = #tpu.dot_dimension_numbers<[1], [0], [0], [1], [0, 0, 1, 1], [], []>} : vector<16x256xbf16>, vector<256x256xbf16>, vector<16x256xf32> -> vector<16x256xf32>
    %c1_i32_37 = arith.constant 1 : i32
    %64 = tpu.dynamic_rotate %57 by %c1_i32_37 dim 0 : vector<16x256xf32>, i32 -> vector<16x256xf32>
    %cst_38 = arith.constant 0.000000e+00 : f32
    %65 = vector.shape_cast %24 : vector<16x1xi1> to vector<16x1xi1>
    %66 = vector.broadcast %65 : vector<16x1xi1> to vector<16x256xi1>
    %67 = vector.broadcast %cst_38 : f32 to vector<16x256xf32>
    %68 = arith.select %66, %67, %64 : vector<16x256xi1>, vector<16x256xf32>
    %69 = arith.addf %60, %68 : vector<16x256xf32>
    %c15_i32_39 = arith.constant 15 : i32
    %70 = tpu.dynamic_rotate %63 by %c15_i32_39 dim 0 : vector<16x256xf32>, i32 -> vector<16x256xf32>
    %cst_40 = arith.constant 0.000000e+00 : f32
    %71 = vector.shape_cast %26 : vector<16x1xi1> to vector<16x1xi1>
    %72 = vector.broadcast %71 : vector<16x1xi1> to vector<16x256xi1>
    %73 = vector.broadcast %cst_40 : f32 to vector<16x256xf32>
    %74 = arith.select %72, %73, %70 : vector<16x256xi1>, vector<16x256xf32>
    %75 = arith.addf %69, %74 : vector<16x256xf32>
    %c0_41 = arith.constant 0 : index
    %c0_42 = arith.constant 0 : index
    %76 = vector.load %arg7[%c0_41, %c0_42] : memref<1x256xf32, #tpu.memory_space<vmem>>, vector<1x256xf32>
    %77 = vector.broadcast %76 : vector<1x256xf32> to vector<16x256xf32>
    %78 = arith.addf %75, %77 : vector<16x256xf32>
    %cst_43 = arith.constant 0.000000e+00 : f32
    %79 = vector.broadcast %cst_43 : f32 to vector<16x256xf32>
    %80 = arith.maximumf %78, %79 : vector<16x256xf32>
    %81 = arith.truncf %80 : vector<16x256xf32> to vector<16x256xbf16>
    %c0_44 = arith.constant 0 : index
    %c0_45 = arith.constant 0 : index
    %c0_46 = arith.constant 0 : index
    %82 = vector.load %arg8[%c0_44, %c0_45, %c0_46] : memref<3x256x256xbf16, #tpu.memory_space<vmem>>, vector<1x256x256xbf16>
    %83 = vector.shape_cast %82 : vector<1x256x256xbf16> to vector<256x256xbf16>
    %cst_47 = arith.constant dense<0.000000e+00> : vector<16x256xf32>
    %84 = tpu.matmul %81, %83, %cst_47 {dimension_numbers = #tpu.dot_dimension_numbers<[1], [0], [0], [1], [0, 0, 1, 1], [], []>} : vector<16x256xbf16>, vector<256x256xbf16>, vector<16x256xf32> -> vector<16x256xf32>
    %c1_48 = arith.constant 1 : index
    %c0_49 = arith.constant 0 : index
    %c0_50 = arith.constant 0 : index
    %85 = vector.load %arg8[%c1_48, %c0_49, %c0_50] : memref<3x256x256xbf16, #tpu.memory_space<vmem>>, vector<1x256x256xbf16>
    %86 = vector.shape_cast %85 : vector<1x256x256xbf16> to vector<256x256xbf16>
    %cst_51 = arith.constant dense<0.000000e+00> : vector<16x256xf32>
    %87 = tpu.matmul %81, %86, %cst_51 {dimension_numbers = #tpu.dot_dimension_numbers<[1], [0], [0], [1], [0, 0, 1, 1], [], []>} : vector<16x256xbf16>, vector<256x256xbf16>, vector<16x256xf32> -> vector<16x256xf32>
    %c2_52 = arith.constant 2 : index
    %c0_53 = arith.constant 0 : index
    %c0_54 = arith.constant 0 : index
    %88 = vector.load %arg8[%c2_52, %c0_53, %c0_54] : memref<3x256x256xbf16, #tpu.memory_space<vmem>>, vector<1x256x256xbf16>
    %89 = vector.shape_cast %88 : vector<1x256x256xbf16> to vector<256x256xbf16>
    %cst_55 = arith.constant dense<0.000000e+00> : vector<16x256xf32>
    %90 = tpu.matmul %81, %89, %cst_55 {dimension_numbers = #tpu.dot_dimension_numbers<[1], [0], [0], [1], [0, 0, 1, 1], [], []>} : vector<16x256xbf16>, vector<256x256xbf16>, vector<16x256xf32> -> vector<16x256xf32>
    %c1_i32_56 = arith.constant 1 : i32
    %91 = tpu.dynamic_rotate %84 by %c1_i32_56 dim 0 : vector<16x256xf32>, i32 -> vector<16x256xf32>
    %cst_57 = arith.constant 0.000000e+00 : f32
    %92 = vector.shape_cast %24 : vector<16x1xi1> to vector<16x1xi1>
    %93 = vector.broadcast %92 : vector<16x1xi1> to vector<16x256xi1>
    %94 = vector.broadcast %cst_57 : f32 to vector<16x256xf32>
    %95 = arith.select %93, %94, %91 : vector<16x256xi1>, vector<16x256xf32>
    %96 = arith.addf %87, %95 : vector<16x256xf32>
    %c15_i32_58 = arith.constant 15 : i32
    %97 = tpu.dynamic_rotate %90 by %c15_i32_58 dim 0 : vector<16x256xf32>, i32 -> vector<16x256xf32>
    %cst_59 = arith.constant 0.000000e+00 : f32
    %98 = vector.shape_cast %26 : vector<16x1xi1> to vector<16x1xi1>
    %99 = vector.broadcast %98 : vector<16x1xi1> to vector<16x256xi1>
    %100 = vector.broadcast %cst_59 : f32 to vector<16x256xf32>
    %101 = arith.select %99, %100, %97 : vector<16x256xi1>, vector<16x256xf32>
    %102 = arith.addf %96, %101 : vector<16x256xf32>
    %c0_60 = arith.constant 0 : index
    %c0_61 = arith.constant 0 : index
    %103 = vector.load %arg9[%c0_60, %c0_61] : memref<1x256xf32, #tpu.memory_space<vmem>>, vector<1x256xf32>
    %104 = vector.broadcast %103 : vector<1x256xf32> to vector<16x256xf32>
    %105 = arith.addf %102, %104 : vector<16x256xf32>
    %cst_62 = arith.constant 0.000000e+00 : f32
    %106 = vector.broadcast %cst_62 : f32 to vector<16x256xf32>
    %107 = arith.maximumf %105, %106 : vector<16x256xf32>
    %c0_63 = arith.constant 0 : index
    %c0_64 = arith.constant 0 : index
    %108 = vector.load %arg10[%c0_63, %c0_64] : memref<1x256xf32, #tpu.memory_space<vmem>>, vector<1x256xf32>
    %cst_65 = arith.constant dense<0.000000e+00> : vector<1x16xf32>
    %109 = tpu.matmul %108, %107, %cst_65 {dimension_numbers = #tpu.dot_dimension_numbers<[1], [1], [0], [0], [0, 0, 1, 0], [], []>} : vector<1x256xf32>, vector<16x256xf32>, vector<1x16xf32> -> vector<1x16xf32>
    %c0_66 = arith.constant 0 : index
    %c0_67 = arith.constant 0 : index
    %110 = memref.load %arg11[%c0_66, %c0_67] : memref<1x1xf32, #tpu.memory_space<smem>>
    %111 = vector.broadcast %110 : f32 to vector<1x16xf32>
    %112 = arith.addf %109, %111 : vector<1x16xf32>
    %c0_68 = arith.constant 0 : index
    %c0_69 = arith.constant 0 : index
    %c0_70 = arith.constant 0 : index
    %113 = vector.load %arg12[%c0_68, %c0_69, %c0_70] : memref<1x1x16xf32, #tpu.memory_space<vmem>>, vector<1x1x16xf32>
    %114 = vector.shape_cast %113 : vector<1x1x16xf32> to vector<1x16xf32>
    %115 = vector.shape_cast %112 : vector<1x16xf32> to vector<1x1x16xf32>
    tpu.vector_store %arg12[%c0_68, %c0_69, %c0_70], %115 {strides = array<i32>} : memref<1x1x16xf32, #tpu.memory_space<vmem>>, vector<1x1x16xf32>,
    return
  }
  func.func @transform_0(%arg0: i32) -> (i32, i32) {
    %c0_i32 = arith.constant 0 : i32
    %c0_i32_0 = arith.constant 0 : i32
    return %arg0, %c0_i32 : i32, i32
  }
  func.func @transform_1(%arg0: i32) -> (i32, i32) {
    %c0_i32 = arith.constant 0 : i32
    %c0_i32_0 = arith.constant 0 : i32
    %c0_i32_1 = arith.constant 0 : i32
    return %c0_i32, %c0_i32_0 : i32, i32
  }
  func.func @transform_2(%arg0: i32) -> (i32, i32) {
    %c0_i32 = arith.constant 0 : i32
    %c0_i32_0 = arith.constant 0 : i32
    %c0_i32_1 = arith.constant 0 : i32
    return %c0_i32, %c0_i32_0 : i32, i32
  }
  func.func @transform_3(%arg0: i32) -> (i32, i32, i32) {
    %c0_i32 = arith.constant 0 : i32
    %c0_i32_0 = arith.constant 0 : i32
    %c0_i32_1 = arith.constant 0 : i32
    %c0_i32_2 = arith.constant 0 : i32
    return %c0_i32, %c0_i32_0, %c0_i32_1 : i32, i32, i32
  }
  func.func @transform_4(%arg0: i32) -> (i32, i32) {
    %c0_i32 = arith.constant 0 : i32
    %c0_i32_0 = arith.constant 0 : i32
    %c0_i32_1 = arith.constant 0 : i32
    return %c0_i32, %c0_i32_0 : i32, i32
  }
  func.func @transform_5(%arg0: i32) -> (i32, i32, i32) {
    %c0_i32 = arith.constant 0 : i32
    %c0_i32_0 = arith.constant 0 : i32
    %c0_i32_1 = arith.constant 0 : i32
    %c0_i32_2 = arith.constant 0 : i32
    return %c0_i32, %c0_i32_0, %c0_i32_1 : i32, i32, i32
  }
  func.func @transform_6(%arg0: i32) -> (i32, i32) {
    %c0_i32 = arith.constant 0 : i32
    %c0_i32_0 = arith.constant 0 : i32
    %c0_i32_1 = arith.constant 0 : i32
    return %c0_i32, %c0_i32_0 : i32, i32
  }
  func.func @transform_7(%arg0: i32) -> (i32, i32, i32) {
    %c0_i32 = arith.constant 0 : i32
    %c0_i32_0 = arith.constant 0 : i32
    %c0_i32_1 = arith.constant 0 : i32
    %c0_i32_2 = arith.constant 0 : i32
    return %c0_i32, %c0_i32_0, %c0_i32_1 : i32, i32, i32
  }
  func.func @transform_8(%arg0: i32) -> (i32, i32) {
    %c0_i32 = arith.constant 0 : i32
    %c0_i32_0 = arith.constant 0 : i32
    %c0_i32_1 = arith.constant 0 : i32
    return %c0_i32, %c0_i32_0 : i32, i32
  }
  func.func @transform_9(%arg0: i32) -> (i32, i32) {
    %c0_i32 = arith.constant 0 : i32
    %c0_i32_0 = arith.constant 0 : i32
    %c0_i32_1 = arith.constant 0 : i32
    return %c0_i32, %c0_i32_0 : i32, i32
  }
  func.func @transform_10(%arg0: i32) -> (i32, i32) {
    %c0_i32 = arith.constant 0 : i32
    %c0_i32_0 = arith.constant 0 : i32
    %c0_i32_1 = arith.constant 0 : i32
    return %c0_i32, %c0_i32_0 : i32, i32
  }
  func.func @transform_11(%arg0: i32) -> (i32, i32, i32) {
    %c0_i32 = arith.constant 0 : i32
    %c0_i32_0 = arith.constant 0 : i32
    %c0_i32_1 = arith.constant 0 : i32
    return %arg0, %c0_i32, %c0_i32_0 : i32, i32, i32
  }
}

</mosaic_0001>

<bundles_post_ra>
// kernel: tpu_custom_call.1
= control target key start
LH: loop header
LB: loop body
LE: loop exit
PB: predicated region body
PF: predicated region fallthrough
CT: control target
= control target key end

     0   :  { %17 = vsyncpa [#allocation4], 0  ;;  %s4060_s0 = inlined_call_operand.hbm [shape: bf16[16,32], index: 0, kind: input, shape index: {}]   ;;  %s4061_s1 = inlined_call_operand.hbm [shape: bf16[32,256], index: 1, kind: input, shape index: {}]   ;;  %s4062_s2 = inlined_call_operand.hbm [shape: f32[1,256], index: 2, kind: input, shape index: {}]   ;;  %s4063_s3 = inlined_call_operand.hbm [shape: bf16[3,256,256], index: 3, kind: input, shape index: {}]   ;;  %s4064_s4 = inlined_call_operand.hbm [shape: f32[1,256], index: 4, kind: input, shape index: {}]   ;;  %s4065_s5 = inlined_call_operand.hbm [shape: bf16[3,256,256], index: 5, kind: input, shape index: {}]   ;;  %s4066_s6 = inlined_call_operand.hbm [shape: f32[1,256], index: 6, kind: input, shape index: {}]   ;;  %s4067_s7 = inlined_call_operand.hbm [shape: bf16[3,256,256], index: 7, kind: input, shape index: {}]   ;;  %s4068_s8 = inlined_call_operand.hbm [shape: f32[1,256], index: 8, kind: input, shape index: {}]   ;;  %s4069_s9 = inlined_call_operand.hbm [shape: f32[1,256], index: 9, kind: input, shape index: {}]   ;;  %s4070_s10 = inlined_call_operand.<no memory space> [shape: f32[1,1], index: 10, kind: input, shape index: {}]   ;;  %s4071_s11 = inlined_call_operand.hbm [shape: f32[1,1,16], index: 11, kind: output, shape index: {}]  }
   0x1   :  { %18 = vsyncpa [#allocation7], 0 }
   0x2   :  { %19 = vsyncpa [#allocation10], 0 }
   0x3   :  { %20 = vsyncpa [#allocation13], 0 }
   0x4   :  { %21 = vsyncpa [#allocation16], 0 }
   0x5   :  { %22 = vsyncpa [#allocation19], 0 }
   0x6   :  { %23 = vsyncpa [#allocation5], 0  ;;  %s3684_s17 = smov [#allocation6]   ;;  %s3428_s21 = scalar_lea.hbm %s4061_s1, 512 }
   0x7   :  { %s41_s18 = sshll.u32 %s3684_s17, 4  ;;  %p3429_p0 = scmp.ne.s32.totalorder %s4061_s1, %s3428_s21  ;;  %s42_s18 = int_to_ptr.vmem [resolvable:$true] %s41_s18 }
   0x8   :  { %p3432_p1 = scmp.lt.u32.totalorder %s3428_s21, %s4061_s1 }
   0xa   :  { %p3434_p2 = pnand %p3432_p1, %p3429_p0 }
   0xc   :  { %3437 = shalt.err (!%p3434_p2)
}
   0xd   :  { %s3438_s26 = scalar_lea.vmem %s42_s18, 512  ;;  %p3443_p4 = scmp.lt.s32.totalorder %s42_s18, %s42_s18 }
   0xe   :  { %p3439_p3 = scmp.ne.s32.totalorder %s42_s18, %s3438_s26  ;;  %p3444_p5 = scmp.lt.s32.totalorder %s3438_s26, %s3438_s26 }
  0x10   :  { %p3445_p6 = por %p3444_p5, %p3443_p4 }
  0x12   :  { %p3446_p7 = pnand %p3445_p6, %p3439_p3 }
  0x14   :  { %3449 = shalt.err (!%p3446_p7)
}
  0x15   :  { %s3685_s27 = smov 128   ;;  %s3686_s28 = smov 8  }
  0x16   :  { %47 = dma.hbm_to_vmem [thread:$0]  %s4061_s1, 512, %s42_s18, [#allocation7], %s3685_s27, %s3685_s27, %s3686_s28  }
  0x17   :  { %s3687_s12 = smov [#allocation9]   ;;  %s3688_s14 = smov [#allocation12]  }
  0x18   :  { %s63_s13 = sshll.u32 %s3687_s12, 4  ;;  %s85_s15 = sshll.u32 %s3688_s14, 4  ;;  %s64_s13 = int_to_ptr.vmem [resolvable:$true] %s63_s13  ;;  %s86_s15 = int_to_ptr.vmem [resolvable:$true] %s85_s15 }
  0x19   :  { %s3450_s19 = scalar_lea.hbm %s4063_s3, 12288 }
  0x1a   :  { %p3451_p8 = scmp.ne.s32.totalorder %s4063_s3, %s3450_s19  ;;  %p3454_p9 = scmp.lt.u32.totalorder %s3450_s19, %s4063_s3 }
  0x1c   :  { %p3456_p10 = pnand %p3454_p9, %p3451_p8 }
  0x1e   :  { %3459 = shalt.err (!%p3456_p10)
}
  0x1f   :  { %s3460_s1 = scalar_lea.vmem %s64_s13, 12288  ;;  %p3465_p12 = scmp.lt.s32.totalorder %s64_s13, %s64_s13 }
  0x20   :  { %p3461_p11 = scmp.ne.s32.totalorder %s64_s13, %s3460_s1  ;;  %p3466_p13 = scmp.lt.s32.totalorder %s3460_s1, %s3460_s1 }
  0x22   :  { %p3467_p0 = por %p3466_p13, %p3465_p12 }
  0x24   :  { %p3468_p1 = pnand %p3467_p0, %p3461_p11 }
  0x26   :  { %3471 = shalt.err (!%p3468_p1)
}
  0x27   :  { %69 = dma.hbm_to_vmem [thread:$0]  %s4063_s3, 12288, %s64_s13, [#allocation10], %s3685_s27, %s3685_s27, %s3686_s28  }
  0x28   :  { %s3472_s29 = scalar_lea.hbm %s4065_s5, 12288 }
  0x29   :  { %p3473_p2 = scmp.ne.s32.totalorder %s4065_s5, %s3472_s29  ;;  %p3476_p3 = scmp.lt.u32.totalorder %s3472_s29, %s4065_s5 }
  0x2b   :  { %p3478_p4 = pnand %p3476_p3, %p3473_p2 }
  0x2d   :  { %3481 = shalt.err (!%p3478_p4)
}
  0x2e   :  { %s3482_s17 = scalar_lea.vmem %s86_s15, 12288  ;;  %p3487_p6 = scmp.lt.s32.totalorder %s86_s15, %s86_s15 }
  0x2f   :  { %p3483_p5 = scmp.ne.s32.totalorder %s86_s15, %s3482_s17  ;;  %p3488_p7 = scmp.lt.s32.totalorder %s3482_s17, %s3482_s17 }
  0x31   :  { %p3489_p8 = por %p3488_p7, %p3487_p6 }
  0x33   :  { %p3490_p9 = pnand %p3489_p8, %p3483_p5 }
  0x35   :  { %3493 = shalt.err (!%p3490_p9)
}
  0x36   :  { %91 = dma.hbm_to_vmem [thread:$0]  %s4065_s5, 12288, %s86_s15, [#allocation13], %s3685_s27, %s3685_s27, %s3686_s28  }
  0x37   :  { %s3689_s19 = smov [#allocation15]   ;;  %s3690_s21 = smov [#allocation3]  }
  0x38   :  { %s107_s20 = sshll.u32 %s3689_s19, 4  ;;  %s29_s22 = sshll.u32 %s3690_s21, 4  ;;  %s108_s20 = int_to_ptr.vmem [resolvable:$true] %s107_s20  ;;  %s30_s22 = int_to_ptr.vmem [resolvable:$true] %s29_s22 }
  0x39   :  { %s3494_s18 = scalar_lea.hbm %s4067_s7, 12288 }
  0x3a   :  { %p3495_p10 = scmp.ne.s32.totalorder %s4067_s7, %s3494_s18  ;;  %p3498_p11 = scmp.lt.u32.totalorder %s3494_s18, %s4067_s7 }
  0x3c   :  { %p3500_p12 = pnand %p3498_p11, %p3495_p10 }
  0x3e   :  { %3503 = shalt.err (!%p3500_p12)
}
  0x3f   :  { %s3504_s5 = scalar_lea.vmem %s108_s20, 12288  ;;  %p3509_p0 = scmp.lt.s32.totalorder %s108_s20, %s108_s20 }
  0x40   :  { %p3505_p13 = scmp.ne.s32.totalorder %s108_s20, %s3504_s5  ;;  %p3510_p1 = scmp.lt.s32.totalorder %s3504_s5, %s3504_s5 }
  0x42   :  { %p3511_p2 = por %p3510_p1, %p3509_p0 }
  0x44   :  { %p3512_p3 = pnand %p3511_p2, %p3505_p13 }
  0x46   :  { %3515 = shalt.err (!%p3512_p3)
}
  0x47   :  { %113 = dma.hbm_to_vmem [thread:$0]  %s4067_s7, 12288, %s108_s20, [#allocation16], %s3685_s27, %s3685_s27, %s3686_s28  }
  0x48   :  { %s3516_s16 = scalar_lea.hbm %s4060_s0, 128 }
  0x49   :  { %p3517_p4 = scmp.ne.s32.totalorder %s4060_s0, %s3516_s16  ;;  %p3520_p5 = scmp.lt.u32.totalorder %s3516_s16, %s4060_s0 }
  0x4b   :  { %p3522_p6 = pnand %p3520_p5, %p3517_p4 }
  0x4d   :  { %3525 = shalt.err (!%p3522_p6)
}
  0x4e   :  { %s3526_s21 = scalar_lea.vmem %s30_s22, 128  ;;  %p3531_p8 = scmp.lt.s32.totalorder %s30_s22, %s30_s22 }
  0x4f   :  { %p3527_p7 = scmp.ne.s32.totalorder %s30_s22, %s3526_s21  ;;  %p3532_p9 = scmp.lt.s32.totalorder %s3526_s21, %s3526_s21 }
  0x51   :  { %p3533_p10 = por %p3532_p9, %p3531_p8 }
  0x53   :  { %p3534_p11 = pnand %p3533_p10, %p3527_p7 }
  0x55   :  { %3537 = shalt.err (!%p3534_p11)
}
  0x56   :  { %s3691_s7 = smov 64   ;;  %s3692_s27 = smov 4  }
  0x57   :  { %35 = dma.hbm_to_vmem [thread:$0]  %s4060_s0, 128, %s30_s22, [#allocation4], %s3691_s7, %s3691_s7, %s3692_s27  }
  0x58   :  { %s3693_s23 = smov [#allocation8]   ;;  %s3694_s18 = smov [#allocation11]  }
  0x59   :  { %s54_s1 = sshll.u32 %s3693_s23, 4  ;;  %s76_s24 = sshll.u32 %s3694_s18, 4  ;;  %s55_s1 = int_to_ptr.vmem [resolvable:$true] %s54_s1  ;;  %s77_s24 = int_to_ptr.vmem [resolvable:$true] %s76_s24 }
  0x5a   :  { %s3538_s29 = scalar_lea.hbm %s4062_s2, 32 }
  0x5b   :  { %p3539_p12 = scmp.ne.s32.totalorder %s4062_s2, %s3538_s29  ;;  %p3542_p13 = scmp.lt.u32.totalorder %s3538_s29, %s4062_s2 }
  0x5d   :  { %p3544_p0 = pnand %p3542_p13, %p3539_p12 }
  0x5f   :  { %3547 = shalt.err (!%p3544_p0)
}
  0x60   :  { %s3548_s0 = scalar_lea.vmem %s55_s1, 32  ;;  %p3553_p2 = scmp.lt.s32.totalorder %s55_s1, %s55_s1 }
  0x61   :  { %p3549_p1 = scmp.ne.s32.totalorder %s55_s1, %s3548_s0  ;;  %p3554_p3 = scmp.lt.s32.totalorder %s3548_s0, %s3548_s0 }
  0x63   :  { %p3555_p4 = por %p3554_p3, %p3553_p2 }
  0x65   :  { %p3556_p5 = pnand %p3555_p4, %p3549_p1 }
  0x67   :  { %3559 = shalt.err (!%p3556_p5)
}
  0x68   :  { %57 = dma.hbm_to_vmem [thread:$0]  %s4062_s2, 32, %s55_s1, [#allocation7]  }
  0x69   :  { %s3560_s3 = scalar_lea.hbm %s4064_s4, 32 }
  0x6a   :  { %p3561_p6 = scmp.ne.s32.totalorder %s4064_s4, %s3560_s3  ;;  %p3564_p7 = scmp.lt.u32.totalorder %s3560_s3, %s4064_s4 }
  0x6c   :  { %p3566_p8 = pnand %p3564_p7, %p3561_p6 }
  0x6e   :  { %3569 = shalt.err (!%p3566_p8)
}
  0x6f   :  { %s3570_s27 = scalar_lea.vmem %s77_s24, 32  ;;  %p3575_p10 = scmp.lt.s32.totalorder %s77_s24, %s77_s24 }
  0x70   :  { %p3571_p9 = scmp.ne.s32.totalorder %s77_s24, %s3570_s27  ;;  %p3576_p11 = scmp.lt.s32.totalorder %s3570_s27, %s3570_s27 }
  0x72   :  { %p3577_p12 = por %p3576_p11, %p3575_p10 }
  0x74   :  { %p3578_p13 = pnand %p3577_p12, %p3571_p9 }
  0x76   :  { %3581 = shalt.err (!%p3578_p13)
}
  0x77   :  { %79 = dma.hbm_to_vmem [thread:$0]  %s4064_s4, 32, %s77_s24, [#allocation10]  }
  0x78   :  { %s3695_s20 = smov [#allocation14]   ;;  %s3696_s1 = smov [#allocation17]  }
  0x79   :  { %s98_s23 = sshll.u32 %s3695_s20, 4  ;;  %s120_s18 = sshll.u32 %s3696_s1, 4  ;;  %s99_s23 = int_to_ptr.vmem [resolvable:$true] %s98_s23  ;;  %s121_s18 = int_to_ptr.vmem [resolvable:$true] %s120_s18 }
  0x7a   :  { %s3582_s29 = scalar_lea.hbm %s4066_s6, 32 }
  0x7b   :  { %p3583_p0 = scmp.ne.s32.totalorder %s4066_s6, %s3582_s29  ;;  %p3586_p1 = scmp.lt.u32.totalorder %s3582_s29, %s4066_s6 }
  0x7d   :  { %p3588_p2 = pnand %p3586_p1, %p3583_p0 }
  0x7f   :  { %3591 = shalt.err (!%p3588_p2)
}
  0x80   :  { %s3592_s4 = scalar_lea.vmem %s99_s23, 32  ;;  %p3597_p4 = scmp.lt.s32.totalorder %s99_s23, %s99_s23 }
  0x81   :  { %p3593_p3 = scmp.ne.s32.totalorder %s99_s23, %s3592_s4  ;;  %p3598_p5 = scmp.lt.s32.totalorder %s3592_s4, %s3592_s4 }
  0x83   :  { %p3599_p6 = por %p3598_p5, %p3597_p4 }
  0x85   :  { %p3600_p7 = pnand %p3599_p6, %p3593_p3 }
  0x87   :  { %3603 = shalt.err (!%p3600_p7)
}
  0x88   :  { %101 = dma.hbm_to_vmem [thread:$0]  %s4066_s6, 32, %s99_s23, [#allocation13]  }
  0x89   :  { %s3604_s16 = scalar_lea.hbm %s4068_s8, 32 }
  0x8a   :  { %p3605_p8 = scmp.ne.s32.totalorder %s4068_s8, %s3604_s16  ;;  %p3608_p9 = scmp.lt.u32.totalorder %s3604_s16, %s4068_s8 }
  0x8c   :  { %p3610_p10 = pnand %p3608_p9, %p3605_p8 }
  0x8e   :  { %3613 = shalt.err (!%p3610_p10)
}
  0x8f   :  { %s3614_s21 = scalar_lea.vmem %s121_s18, 32  ;;  %p3619_p12 = scmp.lt.s32.totalorder %s121_s18, %s121_s18 }
  0x90   :  { %p3615_p11 = scmp.ne.s32.totalorder %s121_s18, %s3614_s21  ;;  %p3620_p13 = scmp.lt.s32.totalorder %s3614_s21, %s3614_s21 }
  0x92   :  { %p3621_p0 = por %p3620_p13, %p3619_p12 }
  0x94   :  { %p3622_p1 = pnand %p3621_p0, %p3615_p11 }
  0x96   :  { %3625 = shalt.err (!%p3622_p1)
}
  0x97   :  { %123 = dma.hbm_to_vmem [thread:$0]  %s4068_s8, 32, %s121_s18, [#allocation16]  }
  0x98   :  { %s3697_s27 = smov [#allocation18]   ;;  %s3626_s23 = scalar_lea.hbm %s4069_s9, 32 }
  0x99   :  { %s130_s2 = sshll.u32 %s3697_s27, 4  ;;  %p3627_p2 = scmp.ne.s32.totalorder %s4069_s9, %s3626_s23  ;;  %s131_s2 = int_to_ptr.vmem [resolvable:$true] %s130_s2 }
  0x9a   :  { %p3630_p3 = scmp.lt.u32.totalorder %s3626_s23, %s4069_s9 }
  0x9c   :  { %p3632_p4 = pnand %p3630_p3, %p3627_p2 }
  0x9e   :  { %3635 = shalt.err (!%p3632_p4)
}
  0x9f   :  { %s3636_s5 = scalar_lea.vmem %s131_s2, 32  ;;  %p3641_p6 = scmp.lt.s32.totalorder %s131_s2, %s131_s2 }
  0xa0   :  { %p3637_p5 = scmp.ne.s32.totalorder %s131_s2, %s3636_s5  ;;  %p3642_p7 = scmp.lt.s32.totalorder %s3636_s5, %s3636_s5 }
  0xa2   :  { %p3643_p8 = por %p3642_p7, %p3641_p6 }
  0xa4   :  { %p3644_p9 = pnand %p3643_p8, %p3637_p5 }
  0xa6   :  { %3647 = shalt.err (!%p3644_p9)
}
  0xa7   :  { %133 = dma.hbm_to_vmem [thread:$0]  %s4069_s9, 32, %s131_s2, [#allocation19]  }
  0xa8   :  { %3670 = dma.done.wait [#allocation4], 128  }
  0xa9   :  { %3671 = vsyncadd [#allocation4], 4294967168 }
  0xaa   :  { %3672 = dma.done.wait [#allocation7], 544  }
  0xab   :  { %3673 = vsyncadd [#allocation7], 4294966752 }
  0xac   :  { %3674 = dma.done.wait [#allocation10], 12320  }
  0xad   :  { %3675 = vsyncadd [#allocation10], 4294954976 }
  0xae   :  { %3676 = dma.done.wait [#allocation13], 12320  }
  0xaf   :  { %3677 = vsyncadd [#allocation13], 4294954976 }
  0xb0   :  { %3678 = dma.done.wait [#allocation16], 12320  }
  0xb1   :  { %3679 = vsyncadd [#allocation16], 4294954976 }
  0xb2   :  { %3680 = dma.done.wait [#allocation19], 32  }
  0xb3   :  { %3681 = vsyncadd [#allocation19], 4294967264  ;;  %v3698_v0 = vmov 0   ;;  %v2989_v1 = vld [vmem:[#allocation6 + $0x4] ss:$8 sps:$4 sm:$0xff]   ;;  %v2995_v5 = vld [vmem:[#allocation3] sm:$0xff]  }
  0xb4   :  { %246 = vmatprep.mubr.bf16.mxu0 %v3698_v0  ;;  %v2991_v2 = vld [vmem:[#allocation6] ss:$8 sps:$4 sm:$0xff]   ;;  %214 = vmatprep.subr.bf16.mxu0 %v2989_v1  ;;  %v2992_v3 = vld [vmem:[#allocation6 + $0x14] ss:$8 sps:$4 sm:$0xff]   ;;  %v2994_v4 = vld [vmem:[#allocation6 + $0x10] ss:$8 sps:$4 sm:$0xff]  }
  0xb5   :  { %215 = vmatpush1.bf16.msra.mxu0 %v2991_v2  ;;  %v2996_v6 = vld [vmem:[#allocation9 + $0x4] ss:$8 sps:$4 sm:$0xff]   ;;  %v2998_v7 = vld [vmem:[#allocation9] ss:$8 sps:$4 sm:$0xff]   ;;  %vm210_vm0 = vcmask 261120   ;;  %s3699_s30 = smov [#allocation20]  }
  0xb6   :  { %216 = vmatprep.subr.bf16.mxu0 %v2992_v3  ;;  %v2999_v8 = vld [vmem:[#allocation9 + $0x200] ss:$8 sps:$4 sm:$0xff]   ;;  %482 = vmatprep.subr.bf16.mxu1 %v2996_v6  ;;  %v3001_v9 = vld [vmem:[#allocation9 + $0x204] ss:$8 sps:$4 sm:$0xff]   ;;  %v3002_v10 = vld [vmem:[#allocation9 + $0x14] ss:$8 sps:$4 sm:$0xff]  }
  0xb7   :  { %483 = vmatpush1.bf16.msra.mxu1 %v2998_v7  ;;  %v3004_v11 = vld [vmem:[#allocation9 + $0x10] ss:$8 sps:$4 sm:$0xff]   ;;  %v3007_v12 = vld [vmem:[#allocation9 + $0x214] ss:$8 sps:$4 sm:$0xff]   ;;  %v3008_v13 = vld [vmem:[#allocation9 + $0x24] ss:$8 sps:$4 sm:$0xff]   ;;  %v175_v7 = vlaneseq }
  0xb8   :  { %484 = vmatprep.subr.bf16.mxu1 %v3002_v10  ;;  %v3005_v14 = vld [vmem:[#allocation9 + $0x210] ss:$8 sps:$4 sm:$0xff]   ;;  %v3010_v15 = vld [vmem:[#allocation9 + $0x20] ss:$8 sps:$4 sm:$0xff]   ;;  %v3013_v16 = vld [vmem:[#allocation9 + $0x224] ss:$8 sps:$4 sm:$0xff]  }
  0xb9   :  { %217 = vmatpush1.bf16.msra.mxu0 %v2994_v4  ;;  %v3014_v17 = vld [vmem:[#allocation9 + $0x34] ss:$8 sps:$4 sm:$0xff]   ;;  %v3011_v18 = vld [vmem:[#allocation9 + $0x220] ss:$8 sps:$4 sm:$0xff]   ;;  %v3016_v19 = vld [vmem:[#allocation9 + $0x30] ss:$8 sps:$4 sm:$0xff]  }
  0xba   :  { %751 = vmatprep.subr.bf16.mxu0 %v3001_v9  ;;  %v3019_v20 = vld [vmem:[#allocation9 + $0x234] ss:$8 sps:$4 sm:$0xff]   ;;  %v3020_v21 = vld [vmem:[#allocation9 + $0x44] ss:$8 sps:$4 sm:$0xff]   ;;  %v3017_v22 = vld [vmem:[#allocation9 + $0x230] ss:$8 sps:$4 sm:$0xff]  }
  0xbb   :  { %485 = vmatpush1.bf16.msra.mxu1 %v3004_v11  ;;  %v3022_v23 = vld [vmem:[#allocation9 + $0x40] ss:$8 sps:$4 sm:$0xff]   ;;  %v3025_v24 = vld [vmem:[#allocation9 + $0x244] ss:$8 sps:$4 sm:$0xff]   ;;  %v3026_v25 = vld [vmem:[#allocation9 + $0x54] ss:$8 sps:$4 sm:$0xff]  }
  0xbc   :  { %2680 = vmatmul.mubr.msk.bf16.vlgmr.msra.gmra.mrb[0].mxu0 %vm210_vm0, %v2995_v5  ;;  %486 = vmatprep.subr.bf16.mxu1 %v3008_v13  ;;  %v3023_v26 = vld [vmem:[#allocation9 + $0x240] ss:$8 sps:$4 sm:$0xff]   ;;  %v3028_v27 = vld [vmem:[#allocation9 + $0x50] ss:$8 sps:$4 sm:$0xff]   ;;  %v3031_v28 = vld [vmem:[#allocation9 + $0x254] ss:$8 sps:$4 sm:$0xff]  }
  0xbd   :  { %752 = vmatpush1.bf16.msra.mxu0 %v2999_v8  ;;  %v3032_v29 = vld [vmem:[#allocation9 + $0x64] ss:$8 sps:$4 sm:$0xff]   ;;  %v3029_v30 = vld [vmem:[#allocation9 + $0x250] ss:$8 sps:$4 sm:$0xff]   ;;  %v3034_v31 = vld [vmem:[#allocation9 + $0x60] ss:$8 sps:$4 sm:$0xff]  }
  0xbe   :  { %753 = vmatprep.subr.bf16.mxu0 %v3007_v12  ;;  %v3037_v32 = vld [vmem:[#allocation9 + $0x264] ss:$8 sps:$4 sm:$0xff]   ;;  %v3038_v33 = vld [vmem:[#allocation9 + $0x74] ss:$8 sps:$4 sm:$0xff]   ;;  %v3035_v34 = vld [vmem:[#allocation9 + $0x260] ss:$8 sps:$4 sm:$0xff]  }
  0xbf   :  { %487 = vmatpush1.bf16.msra.mxu1 %v3010_v15  ;;  %v3040_v35 = vld [vmem:[#allocation9 + $0x70] ss:$8 sps:$4 sm:$0xff]   ;;  %v3043_v36 = vld [vmem:[#allocation9 + $0x274] ss:$8 sps:$4 sm:$0xff]   ;;  %v3044_v37 = vld [vmem:[#allocation9 + $0x84] ss:$8 sps:$4 sm:$0xff]  }
  0xc0   :  { %488 = vmatprep.subr.bf16.mxu1 %v3014_v17  ;;  %v3041_v38 = vld [vmem:[#allocation9 + $0x270] ss:$8 sps:$4 sm:$0xff]   ;;  %v3046_v39 = vld [vmem:[#allocation9 + $0x80] ss:$8 sps:$4 sm:$0xff]   ;;  %v3049_v40 = vld [vmem:[#allocation9 + $0x284] ss:$8 sps:$4 sm:$0xff]  }
  0xc1   :  { %754 = vmatpush1.bf16.msra.mxu0 %v3005_v14  ;;  %v3050_v41 = vld [vmem:[#allocation9 + $0x94] ss:$8 sps:$4 sm:$0xff]   ;;  %v3047_v42 = vld [vmem:[#allocation9 + $0x280] ss:$8 sps:$4 sm:$0xff]   ;;  %v3052_v43 = vld [vmem:[#allocation9 + $0x90] ss:$8 sps:$4 sm:$0xff]  }
  0xc2   :  { %755 = vmatprep.subr.bf16.mxu0 %v3013_v16  ;;  %v3055_v44 = vld [vmem:[#allocation9 + $0x294] ss:$8 sps:$4 sm:$0xff]   ;;  %v3056_v45 = vld [vmem:[#allocation9 + $0xa4] ss:$8 sps:$4 sm:$0xff]   ;;  %v3053_v46 = vld [vmem:[#allocation9 + $0x290] ss:$8 sps:$4 sm:$0xff]  }
  0xc3   :  { %489 = vmatpush1.bf16.msra.mxu1 %v3016_v19  ;;  %v3058_v47 = vld [vmem:[#allocation9 + $0xa0] ss:$8 sps:$4 sm:$0xff]   ;;  %v3061_v48 = vld [vmem:[#allocation9 + $0x2a4] ss:$8 sps:$4 sm:$0xff]   ;;  %v3062_v49 = vld [vmem:[#allocation9 + $0xb4] ss:$8 sps:$4 sm:$0xff]  }
  0xc4   :  { %490 = vmatprep.subr.bf16.mxu1 %v3020_v21  ;;  %v3059_v50 = vld [vmem:[#allocation9 + $0x2a0] ss:$8 sps:$4 sm:$0xff]   ;;  %v3064_v51 = vld [vmem:[#allocation9 + $0xb0] ss:$8 sps:$4 sm:$0xff]   ;;  %v3067_v52 = vld [vmem:[#allocation9 + $0x2b4] ss:$8 sps:$4 sm:$0xff]  }
  0xc5   :  { %756 = vmatpush1.bf16.msra.mxu0 %v3011_v18  ;;  %v3068_v53 = vld [vmem:[#allocation9 + $0xc4] ss:$8 sps:$4 sm:$0xff]   ;;  %v3065_v54 = vld [vmem:[#allocation9 + $0x2b0] ss:$8 sps:$4 sm:$0xff]   ;;  %v3070_v55 = vld [vmem:[#allocation9 + $0xc0] ss:$8 sps:$4 sm:$0xff]  }
  0xc6   :  { %757 = vmatprep.subr.bf16.mxu0 %v3019_v20  ;;  %v3073_v56 = vld [vmem:[#allocation9 + $0x2c4] ss:$8 sps:$4 sm:$0xff]   ;;  %v3074_v57 = vld [vmem:[#allocation9 + $0xd4] ss:$8 sps:$4 sm:$0xff]   ;;  %v3071_v58 = vld [vmem:[#allocation9 + $0x2c0] ss:$8 sps:$4 sm:$0xff]  }
  0xc7   :  { %491 = vmatpush1.bf16.msra.mxu1 %v3022_v23  ;;  %v3076_v59 = vld [vmem:[#allocation9 + $0xd0] ss:$8 sps:$4 sm:$0xff]   ;;  %v3079_v60 = vld [vmem:[#allocation9 + $0x2d4] ss:$8 sps:$4 sm:$0xff]   ;;  %v3080_v62 = vld [vmem:[#allocation9 + $0xe4] ss:$8 sps:$4 sm:$0xff]  }
  0xc8   :  { %492 = vmatprep.subr.bf16.mxu1 %v3026_v25  ;;  %v3077_v61 = vld [vmem:[#allocation9 + $0x2d0] ss:$8 sps:$4 sm:$0xff]   ;;  %v3082_v63 = vld [vmem:[#allocation9 + $0xe0] ss:$8 sps:$4 sm:$0xff]   ;;  %v3085_v0 = vld [vmem:[#allocation9 + $0x2e4] ss:$8 sps:$4 sm:$0xff]  }
  0xc9   :  { %758 = vmatpush1.bf16.msra.mxu0 %v3017_v22  ;;  %v3083_v1 = vld [vmem:[#allocation9 + $0x2e0] ss:$8 sps:$4 sm:$0xff]   ;;  %v3086_v2 = vld [vmem:[#allocation9 + $0xf4] ss:$8 sps:$4 sm:$0xff]   ;;  %v3088_v3 = vld [vmem:[#allocation9 + $0xf0] ss:$8 sps:$4 sm:$0xff]  }
  0xca   :  { %759 = vmatprep.subr.bf16.mxu0 %v3025_v24  ;;  %v3091_v4 = vld [vmem:[#allocation9 + $0x2f4] ss:$8 sps:$4 sm:$0xff]   ;;  %v3089_v5 = vld [vmem:[#allocation9 + $0x2f0] ss:$8 sps:$4 sm:$0xff]   ;;  %v3094_v6 = vld [vmem:[#allocation9 + $0x104] ss:$8 sps:$4 sm:$0xff]  }
  0xcb   :  { %493 = vmatpush1.bf16.msra.mxu1 %v3028_v27  ;;  %v3892_v8 = vshrl.u32 %v175_v7, 7  ;;  %v173_v10 = vld [vmem:[#allocation8] sm:$0x3]  ;;  %v3092_v24 = vld [vmem:[#allocation9 + $0x100] ss:$8 sps:$4 sm:$0xff]   ;;  %s2661_s12 = sshll.u32 %s3699_s30, 4  ;;  %s2662_s12 = int_to_ptr.vmem [resolvable:$true] %s2661_s12 }
  0xcc   :  { %494 = vmatprep.subr.bf16.mxu1 %v3032_v29  ;;  %v3097_v25 = vld [vmem:[#allocation9 + $0x114] ss:$8 sps:$4 sm:$0xff]   ;;  %v3100_v27 = vld [vmem:[#allocation9 + $0x124] ss:$8 sps:$4 sm:$0xff]   ;;  %vm2653_vm7 = vcmask 122880   ;;  %s3648_s4 = scalar_lea.vmem %s2662_s12, 16  ;;  %p3653_p11 = scmp.lt.s32.totalorder %s2662_s12, %s2662_s12 }
  0xcd   :  { %760 = vmatpush1.bf16.msra.mxu0 %v3023_v26  ;;  %v3895_v9 = vsub.s32 0, %v3892_v8  ;;  %v3898_v11 = vsub.s32 1, %v3892_v8  ;;  %v3095_v26 = vld [vmem:[#allocation9 + $0x110] ss:$8 sps:$4 sm:$0xff]   ;;  %v3103_v29 = vld [vmem:[#allocation9 + $0x134] ss:$8 sps:$4 sm:$0xff]   ;;  %p3649_p10 = scmp.ne.s32.totalorder %s2662_s12, %s3648_s4 }
  0xce   :  { %761 = vmatprep.subr.bf16.mxu0 %v3031_v28  ;;  %v3098_v28 = vld [vmem:[#allocation9 + $0x120] ss:$8 sps:$4 sm:$0xff]   ;;  %vm798_vm1 = vcmp.lt.s32.totalorder %v3892_v8, 1  ;;  %vm1018_vm2 = vcmp.lt.s32.totalorder %v3892_v8, 7  ;;  %s3652_s24 = scalar_lea.vmem %s2662_s12, 32 }
  0xcf   :  { %495 = vmatpush1.bf16.msra.mxu1 %v3034_v31  ;;  %v178_v12 = vrot.slane %v173_v10, %v3895_v9  ;;  %v182_v14 = vrot.slane %v173_v10, %v3898_v11  ;;  %v3106_v31 = vld [vmem:[#allocation9 + $0x144] ss:$8 sps:$4 sm:$0xff]   ;;  %p3654_p12 = scmp.lt.s32.totalorder %s3652_s24, %s3648_s4 }
  0xd0   :  { %496 = vmatprep.subr.bf16.mxu1 %v3038_v33  ;;  %v3109_v33 = vld [vmem:[#allocation9 + $0x154] ss:$8 sps:$4 sm:$0xff]   ;;  %v3166_v7 = vld [vmem:[#allocation12 + $0x44] ss:$8 sps:$4 sm:$0xff]  }
  0xd1   :  { %762 = vmatpush1.bf16.msra.mxu0 %v3029_v30  ;;  %v3101_v30 = vld [vmem:[#allocation9 + $0x130] ss:$8 sps:$4 sm:$0xff]   ;;  %p3655_p13 = por %p3654_p12, %p3653_p11 }
  0xd2   :  { %763 = vmatprep.subr.bf16.mxu0 %v3037_v32  ;;  %v3104_v32 = vld [vmem:[#allocation9 + $0x140] ss:$8 sps:$4 sm:$0xff]  }
  0xd3   :  { %497 = vmatpush1.bf16.msra.mxu1 %v3040_v35  ;;  %v3112_v35 = vld [vmem:[#allocation9 + $0x164] ss:$8 sps:$4 sm:$0xff]   ;;  %p3656_p0 = pnand %p3655_p13, %p3649_p10 }
  0xd4   :  { %498 = vmatprep.subr.bf16.mxu1 %v3044_v37  ;;  %v3115_v37 = vld [vmem:[#allocation9 + $0x174] ss:$8 sps:$4 sm:$0xff]   ;;  %v3169_v10 = vld [vmem:[#allocation12 + $0x244] ss:$8 sps:$4 sm:$0xff]  }
  0xd5   :  { %764 = vmatpush1.bf16.msra.mxu0 %v3035_v34  ;;  %v3107_v34 = vld [vmem:[#allocation9 + $0x150] ss:$8 sps:$4 sm:$0xff]  }
  0xd6   :  { %765 = vmatprep.subr.bf16.mxu0 %v3043_v36  ;;  %v3110_v36 = vld [vmem:[#allocation9 + $0x160] ss:$8 sps:$4 sm:$0xff]  }
  0xd7   :  { %499 = vmatpush1.bf16.msra.mxu1 %v3046_v39  ;;  %v3118_v39 = vld [vmem:[#allocation9 + $0x184] ss:$8 sps:$4 sm:$0xff]  }
  0xd8   :  { %500 = vmatprep.subr.bf16.mxu1 %v3050_v41  ;;  %v3121_v41 = vld [vmem:[#allocation9 + $0x194] ss:$8 sps:$4 sm:$0xff]  }
  0xd9   :  { %766 = vmatpush1.bf16.msra.mxu0 %v3041_v38  ;;  %v3113_v38 = vld [vmem:[#allocation9 + $0x170] ss:$8 sps:$4 sm:$0xff]  }
  0xda   :  { %767 = vmatprep.subr.bf16.mxu0 %v3049_v40  ;;  %v3116_v40 = vld [vmem:[#allocation9 + $0x180] ss:$8 sps:$4 sm:$0xff]  }
  0xdb   :  { %501 = vmatpush1.bf16.msra.mxu1 %v3052_v43  ;;  %v3124_v43 = vld [vmem:[#allocation9 + $0x1a4] ss:$8 sps:$4 sm:$0xff]  }
  0xdc   :  { %502 = vmatprep.subr.bf16.mxu1 %v3056_v45  ;;  %v3127_v45 = vld [vmem:[#allocation9 + $0x1b4] ss:$8 sps:$4 sm:$0xff]  }
  0xdd   :  { %768 = vmatpush1.bf16.msra.mxu0 %v3047_v42  ;;  %v3119_v42 = vld [vmem:[#allocation9 + $0x190] ss:$8 sps:$4 sm:$0xff]  }
  0xde   :  { %769 = vmatprep.subr.bf16.mxu0 %v3055_v44  ;;  %v3122_v44 = vld [vmem:[#allocation9 + $0x1a0] ss:$8 sps:$4 sm:$0xff]  }
  0xdf   :  { %503 = vmatpush1.bf16.msra.mxu1 %v3058_v47  ;;  %v3130_v47 = vld [vmem:[#allocation9 + $0x1c4] ss:$8 sps:$4 sm:$0xff]  }
  0xe0   :  { %504 = vmatprep.subr.bf16.mxu1 %v3062_v49  ;;  %v3133_v49 = vld [vmem:[#allocation9 + $0x1d4] ss:$8 sps:$4 sm:$0xff]  }
  0xe1   :  { %770 = vmatpush1.bf16.msra.mxu0 %v3053_v46  ;;  %v3125_v46 = vld [vmem:[#allocation9 + $0x1b0] ss:$8 sps:$4 sm:$0xff]  }
  0xe2   :  { %771 = vmatprep.subr.bf16.mxu0 %v3061_v48  ;;  %v3128_v48 = vld [vmem:[#allocation9 + $0x1c0] ss:$8 sps:$4 sm:$0xff]  }
  0xe3   :  { %505 = vmatpush1.bf16.msra.mxu1 %v3064_v51  ;;  %v3136_v51 = vld [vmem:[#allocation9 + $0x1e4] ss:$8 sps:$4 sm:$0xff]  }
  0xe4   :  { %506 = vmatprep.subr.bf16.mxu1 %v3068_v53  ;;  %v3139_v53 = vld [vmem:[#allocation9 + $0x1f4] ss:$8 sps:$4 sm:$0xff]  }
  0xe5   :  { %772 = vmatpush1.bf16.msra.mxu0 %v3059_v50  ;;  %v3131_v50 = vld [vmem:[#allocation9 + $0x1d0] ss:$8 sps:$4 sm:$0xff]  }
  0xe6   :  { %773 = vmatprep.subr.bf16.mxu0 %v3067_v52  ;;  %v3134_v52 = vld [vmem:[#allocation9 + $0x1e0] ss:$8 sps:$4 sm:$0xff]  }
  0xe7   :  { %507 = vmatpush1.bf16.msra.mxu1 %v3070_v55  ;;  %v3140_v55 = vld [vmem:[#allocation12] ss:$8 sps:$4 sm:$0xff]  }
  0xe8   :  { %508 = vmatprep.subr.bf16.mxu1 %v3074_v57  ;;  %v3143_v57 = vld [vmem:[#allocation12 + $0x200] ss:$8 sps:$4 sm:$0xff]  }
  0xe9   :  { %774 = vmatpush1.bf16.msra.mxu0 %v3065_v54  ;;  %v3137_v54 = vld [vmem:[#allocation9 + $0x1f0] ss:$8 sps:$4 sm:$0xff]  }
  0xea   :  { %775 = vmatprep.subr.bf16.mxu0 %v3073_v56  ;;  %v3142_v56 = vld [vmem:[#allocation12 + $0x4] ss:$8 sps:$4 sm:$0xff]  }
  0xeb   :  { %509 = vmatpush1.bf16.msra.mxu1 %v3076_v59  ;;  %v3148_v59 = vld [vmem:[#allocation12 + $0x14] ss:$8 sps:$4 sm:$0xff]  }
  0xec   :  { %510 = vmatprep.subr.bf16.mxu1 %v3080_v62  ;;  %v3149_v62 = vld [vmem:[#allocation12 + $0x210] ss:$8 sps:$4 sm:$0xff]  }
  0xed   :  { %776 = vmatpush1.bf16.msra.mxu0 %v3071_v58  ;;  %v3145_v58 = vld [vmem:[#allocation12 + $0x204] ss:$8 sps:$4 sm:$0xff]  }
  0xee   :  { %777 = vmatprep.subr.bf16.mxu0 %v3079_v60  ;;  %v3151_v60 = vld [vmem:[#allocation12 + $0x214] ss:$8 sps:$4 sm:$0xff]  }
  0xef   :  { %511 = vmatpush1.bf16.msra.mxu1 %v3082_v63  ;;  %v3154_v63 = vld [vmem:[#allocation12 + $0x24] ss:$8 sps:$4 sm:$0xff]  }
  0xf0   :  { %512 = vmatprep.subr.bf16.mxu1 %v3086_v2  ;;  %v3155_v2 = vld [vmem:[#allocation12 + $0x220] ss:$8 sps:$4 sm:$0xff]  }
  0xf1   :  { %778 = vmatpush1.bf16.msra.mxu0 %v3077_v61  ;;  %v3146_v61 = vld [vmem:[#allocation12 + $0x10] ss:$8 sps:$4 sm:$0xff]  }
  0xf2   :  { %779 = vmatprep.subr.bf16.mxu0 %v3085_v0  ;;  %v3157_v0 = vld [vmem:[#allocation12 + $0x224] ss:$8 sps:$4 sm:$0xff]  }
  0xf3   :  { %513 = vmatpush1.bf16.msra.mxu1 %v3088_v3  ;;  %v3160_v3 = vld [vmem:[#allocation12 + $0x34] ss:$8 sps:$4 sm:$0xff]  }
  0xf4   :  { %971 = vmatprep.subr.bf16.mxu1 %v3094_v6  ;;  %v3161_v6 = vld [vmem:[#allocation12 + $0x230] ss:$8 sps:$4 sm:$0xff]  }
  0xf5   :  { %780 = vmatpush1.bf16.msra.mxu0 %v3083_v1  ;;  %v3152_v1 = vld [vmem:[#allocation12 + $0x20] ss:$8 sps:$4 sm:$0xff]  }
  0xf6   :  { %781 = vmatprep.subr.bf16.mxu0 %v3091_v4  ;;  %v3163_v4 = vld [vmem:[#allocation12 + $0x234] ss:$8 sps:$4 sm:$0xff]  }
  0xf9   :  { %782 = vmatpush1.bf16.msra.mxu0 %v3089_v5  ;;  %v3158_v5 = vld [vmem:[#allocation12 + $0x30] ss:$8 sps:$4 sm:$0xff]  }
  0xfa   :  { %1249 = vmatprep.subr.bf16.mxu0 %v3142_v56  ;;  %v3235_v56 = vld [vmem:[#allocation12 + $0x2f4] ss:$8 sps:$4 sm:$0xff]  }
 0x18f   :  { %v248_v13 = vpop.f32.mrb[0].mxu0 }
 0x190   :  { %v250_v15 = vpop.f32.mrb[1].mxu0  ;;  %v249_v17 = vadd.f32 %v248_v13, %v178_v12  ;;  %v3167_v13 = vld [vmem:[#allocation12 + $0x240] ss:$8 sps:$4 sm:$0xff]  }
 0x191   :  { %v252_v16 = vpop.f32.mrb[2].mxu0  ;;  %v251_v20 = vadd.f32 %v250_v15, %v182_v14  ;;  %v3175_v15 = vld [vmem:[#allocation12 + $0x254] ss:$8 sps:$4 sm:$0xff]  }
 0x192   :  { %v253_v18 = vadd.f32 %v252_v16, %v178_v12  ;;  %v254_v19 = vpop.f32.mrb[3].mxu0  ;;  %v3164_v12 = vld [vmem:[#allocation12 + $0x40] ss:$8 sps:$4 sm:$0xff]   ;;  %v3170_v16 = vld [vmem:[#allocation12 + $0x50] ss:$8 sps:$4 sm:$0xff]  }
 0x193   :  { %v255_v21 = vadd.f32 %v254_v19, %v182_v14  ;;  %v3172_v14 = vld [vmem:[#allocation12 + $0x54] ss:$8 sps:$4 sm:$0xff]   ;;  %v3181_v19 = vld [vmem:[#allocation12 + $0x264] ss:$8 sps:$4 sm:$0xff]  }
 0x194   :  { %v3902_v22 = vpack.c.bf16 %v253_v18, %v249_v17  ;;  %v3173_v17 = vld [vmem:[#allocation12 + $0x250] ss:$8 sps:$4 sm:$0xff]   ;;  %v3178_v18 = vld [vmem:[#allocation12 + $0x64] ss:$8 sps:$4 sm:$0xff]  }
 0x195   :  { %v289_v23 = vpack.c.bf16 %v255_v21, %v251_v20  ;;  %v3176_v20 = vld [vmem:[#allocation12 + $0x60] ss:$8 sps:$4 sm:$0xff]  }
 0x196   :  { %v3179_v21 = vld [vmem:[#allocation12 + $0x260] ss:$8 sps:$4 sm:$0xff]  }
 0x197   :  { %514 = vmatprep.mubr.bf16.mxu1 %v289_v23  ;;  %783 = vmatprep.mubr.bf16.mxu0 %v289_v23 }
 0x198   :  { %515 = vmatmul.mubr.bf16.vlgmr.msra.gmra.mrb[0].mxu1 %v3902_v22  ;;  %784 = vmatmul.mubr.bf16.vlgmr.msra.gmra.mrb[4].mxu0 %v3902_v22 }
 0x199   :  { %972 = vmatpush1.bf16.msra.mxu1 %v3092_v24  ;;  %1003 = vmatprep.mubr.bf16.mxu1 %v289_v23  ;;  %v3187_v23 = vld [vmem:[#allocation12 + $0x274] ss:$8 sps:$4 sm:$0xff]   ;;  %v3182_v24 = vld [vmem:[#allocation12 + $0x70] ss:$8 sps:$4 sm:$0xff]  }
 0x19a   :  { %973 = vmatprep.subr.bf16.mxu1 %v3097_v25  ;;  %1250 = vmatpush1.bf16.msra.mxu0 %v3140_v55  ;;  %v3185_v25 = vld [vmem:[#allocation12 + $0x270] ss:$8 sps:$4 sm:$0xff]  }
 0x19b   :  { %1251 = vmatprep.subr.bf16.mxu0 %v3148_v59  ;;  %v3230_v55 = vld [vmem:[#allocation12 + $0xf0] ss:$8 sps:$4 sm:$0xff]  }
 0x19d   :  { %974 = vmatpush1.bf16.msra.mxu1 %v3095_v26  ;;  %v3190_v26 = vld [vmem:[#allocation12 + $0x84] ss:$8 sps:$4 sm:$0xff]  }
 0x19e   :  { %975 = vmatprep.subr.bf16.mxu1 %v3100_v27  ;;  %1252 = vmatpush1.bf16.msra.mxu0 %v3146_v61  ;;  %v3193_v27 = vld [vmem:[#allocation12 + $0x284] ss:$8 sps:$4 sm:$0xff]  }
 0x19f   :  { %1253 = vmatprep.subr.bf16.mxu0 %v3154_v63 }
 0x1a1   :  { %976 = vmatpush1.bf16.msra.mxu1 %v3098_v28  ;;  %v3188_v28 = vld [vmem:[#allocation12 + $0x80] ss:$8 sps:$4 sm:$0xff]  }
 0x1a2   :  { %977 = vmatprep.subr.bf16.mxu1 %v3103_v29  ;;  %1254 = vmatpush1.bf16.msra.mxu0 %v3152_v1  ;;  %v3191_v29 = vld [vmem:[#allocation12 + $0x280] ss:$8 sps:$4 sm:$0xff]  }
 0x1a3   :  { %1255 = vmatprep.subr.bf16.mxu0 %v3160_v3 }
 0x1a5   :  { %978 = vmatpush1.bf16.msra.mxu1 %v3101_v30  ;;  %v3196_v30 = vld [vmem:[#allocation12 + $0x94] ss:$8 sps:$4 sm:$0xff]  }
 0x1a6   :  { %979 = vmatprep.subr.bf16.mxu1 %v3106_v31  ;;  %1256 = vmatpush1.bf16.msra.mxu0 %v3158_v5  ;;  %v3199_v31 = vld [vmem:[#allocation12 + $0x294] ss:$8 sps:$4 sm:$0xff]  }
 0x1a7   :  { %1257 = vmatprep.subr.bf16.mxu0 %v3166_v7 }
 0x1a9   :  { %980 = vmatpush1.bf16.msra.mxu1 %v3104_v32  ;;  %v3194_v32 = vld [vmem:[#allocation12 + $0x90] ss:$8 sps:$4 sm:$0xff]  }
 0x1aa   :  { %981 = vmatprep.subr.bf16.mxu1 %v3109_v33  ;;  %1258 = vmatpush1.bf16.msra.mxu0 %v3164_v12  ;;  %v3197_v33 = vld [vmem:[#allocation12 + $0x290] ss:$8 sps:$4 sm:$0xff]  }
 0x1ab   :  { %1259 = vmatprep.subr.bf16.mxu0 %v3172_v14 }
 0x1ad   :  { %982 = vmatpush1.bf16.msra.mxu1 %v3107_v34  ;;  %v3202_v34 = vld [vmem:[#allocation12 + $0xa4] ss:$8 sps:$4 sm:$0xff]  }
 0x1ae   :  { %983 = vmatprep.subr.bf16.mxu1 %v3112_v35  ;;  %1260 = vmatpush1.bf16.msra.mxu0 %v3170_v16  ;;  %v3205_v35 = vld [vmem:[#allocation12 + $0x2a4] ss:$8 sps:$4 sm:$0xff]  }
 0x1af   :  { %1261 = vmatprep.subr.bf16.mxu0 %v3178_v18 }
 0x1b1   :  { %984 = vmatpush1.bf16.msra.mxu1 %v3110_v36  ;;  %v3200_v36 = vld [vmem:[#allocation12 + $0xa0] ss:$8 sps:$4 sm:$0xff]  }
 0x1b2   :  { %985 = vmatprep.subr.bf16.mxu1 %v3115_v37  ;;  %1262 = vmatpush1.bf16.msra.mxu0 %v3176_v20  ;;  %v3203_v37 = vld [vmem:[#allocation12 + $0x2a0] ss:$8 sps:$4 sm:$0xff]  }
 0x1b5   :  { %986 = vmatpush1.bf16.msra.mxu1 %v3113_v38  ;;  %v3208_v38 = vld [vmem:[#allocation12 + $0xb4] ss:$8 sps:$4 sm:$0xff]  }
 0x1b6   :  { %987 = vmatprep.subr.bf16.mxu1 %v3118_v39  ;;  %v3211_v39 = vld [vmem:[#allocation12 + $0x2b4] ss:$8 sps:$4 sm:$0xff]  }
 0x1b9   :  { %988 = vmatpush1.bf16.msra.mxu1 %v3116_v40  ;;  %v3206_v40 = vld [vmem:[#allocation12 + $0xb0] ss:$8 sps:$4 sm:$0xff]  }
 0x1ba   :  { %989 = vmatprep.subr.bf16.mxu1 %v3121_v41  ;;  %v3209_v41 = vld [vmem:[#allocation12 + $0x2b0] ss:$8 sps:$4 sm:$0xff]  }
 0x1bd   :  { %990 = vmatpush1.bf16.msra.mxu1 %v3119_v42  ;;  %v3214_v42 = vld [vmem:[#allocation12 + $0xc4] ss:$8 sps:$4 sm:$0xff]  }
 0x1be   :  { %991 = vmatprep.subr.bf16.mxu1 %v3124_v43  ;;  %v3217_v43 = vld [vmem:[#allocation12 + $0x2c4] ss:$8 sps:$4 sm:$0xff]  }
 0x1c1   :  { %992 = vmatpush1.bf16.msra.mxu1 %v3122_v44  ;;  %v3212_v44 = vld [vmem:[#allocation12 + $0xc0] ss:$8 sps:$4 sm:$0xff]  }
 0x1c2   :  { %993 = vmatprep.subr.bf16.mxu1 %v3127_v45  ;;  %v3215_v45 = vld [vmem:[#allocation12 + $0x2c0] ss:$8 sps:$4 sm:$0xff]  }
 0x1c5   :  { %994 = vmatpush1.bf16.msra.mxu1 %v3125_v46  ;;  %v3220_v46 = vld [vmem:[#allocation12 + $0xd4] ss:$8 sps:$4 sm:$0xff]  }
 0x1c6   :  { %995 = vmatprep.subr.bf16.mxu1 %v3130_v47  ;;  %v3218_v47 = vld [vmem:[#allocation12 + $0xd0] ss:$8 sps:$4 sm:$0xff]  }
 0x1c9   :  { %996 = vmatpush1.bf16.msra.mxu1 %v3128_v48  ;;  %v3223_v48 = vld [vmem:[#allocation12 + $0x2d4] ss:$8 sps:$4 sm:$0xff]  }
 0x1ca   :  { %997 = vmatprep.subr.bf16.mxu1 %v3133_v49  ;;  %v3221_v49 = vld [vmem:[#allocation12 + $0x2d0] ss:$8 sps:$4 sm:$0xff]  }
 0x1cd   :  { %998 = vmatpush1.bf16.msra.mxu1 %v3131_v50  ;;  %v3226_v50 = vld [vmem:[#allocation12 + $0xe4] ss:$8 sps:$4 sm:$0xff]  }
 0x1ce   :  { %999 = vmatprep.subr.bf16.mxu1 %v3136_v51  ;;  %v3224_v51 = vld [vmem:[#allocation12 + $0xe0] ss:$8 sps:$4 sm:$0xff]  }
 0x1d1   :  { %1000 = vmatpush1.bf16.msra.mxu1 %v3134_v52  ;;  %v3229_v52 = vld [vmem:[#allocation12 + $0x2e4] ss:$8 sps:$4 sm:$0xff]  }
 0x1d2   :  { %1001 = vmatprep.subr.bf16.mxu1 %v3139_v53  ;;  %v3227_v53 = vld [vmem:[#allocation12 + $0x2e0] ss:$8 sps:$4 sm:$0xff]  }
 0x1d5   :  { %1002 = vmatpush1.bf16.msra.mxu1 %v3137_v54  ;;  %v3232_v54 = vld [vmem:[#allocation12 + $0xf4] ss:$8 sps:$4 sm:$0xff]  }
 0x1d6   :  { %1518 = vmatprep.subr.bf16.mxu1 %v3145_v58  ;;  %v3238_v58 = vld [vmem:[#allocation12 + $0x104] ss:$8 sps:$4 sm:$0xff]  }
 0x1d8   :  { %1004 = vmatmul.mubr.bf16.vlgmr.msra.gmra.mrb[4].mxu1 %v3902_v22  ;;  %v3184_v22 = vld [vmem:[#allocation12 + $0x74] ss:$8 sps:$4 sm:$0xff]  }
 0x1d9   :  { %1519 = vmatpush1.bf16.msra.mxu1 %v3143_v57  ;;  %1263 = vmatprep.subr.bf16.mxu0 %v3184_v22  ;;  %v3233_v57 = vld [vmem:[#allocation12 + $0x2f0] ss:$8 sps:$4 sm:$0xff]   ;;  %v259_v22 = vadd.s32 8, %v3892_v8 }
 0x1da   :  { %1520 = vmatprep.subr.bf16.mxu1 %v3151_v60  ;;  %1264 = vmatpush1.bf16.msra.mxu0 %v3182_v24 }
 0x1db   :  { %1265 = vmatprep.subr.bf16.mxu0 %v3190_v26  ;;  %v271_v24 = vand.u32 7, %v259_v22  ;;  %v1035_v26 = vld [vmem:[#allocation11] sm:$0x3] }
 0x1dc   :  { %v3271_v22 = vld [vmem:[#allocation12 + $0x1b4] ss:$8 sps:$4 sm:$0xff]  }
 0x1dd   :  { %1521 = vmatpush1.bf16.msra.mxu1 %v3149_v62  ;;  %vm3935_vm5 = vcmp.eq.s32.totalorder %v271_v24, 0  ;;  %vm3944_vm6 = vcmp.eq.s32.totalorder %v271_v24, 7  ;;  %v3274_v24 = vld [vmem:[#allocation12 + $0x1c4] ss:$8 sps:$4 sm:$0xff]  }
 0x1de   :  { %1522 = vmatprep.subr.bf16.mxu1 %v3157_v0  ;;  %1266 = vmatpush1.bf16.msra.mxu0 %v3188_v28 }
 0x1df   :  { %1267 = vmatprep.subr.bf16.mxu0 %v3196_v30 }
 0x1e1   :  { %1523 = vmatpush1.bf16.msra.mxu1 %v3155_v2 }
 0x1e2   :  { %1524 = vmatprep.subr.bf16.mxu1 %v3163_v4  ;;  %1268 = vmatpush1.bf16.msra.mxu0 %v3194_v32  ;;  %v1040_v32 = vrot.slane %v1035_v26, %v3895_v9 }
 0x1e3   :  { %1269 = vmatprep.subr.bf16.mxu0 %v3202_v34 }
 0x1e5   :  { %1525 = vmatpush1.bf16.msra.mxu1 %v3161_v6 }
 0x1e6   :  { %1526 = vmatprep.subr.bf16.mxu1 %v3169_v10  ;;  %1270 = vmatpush1.bf16.msra.mxu0 %v3200_v36 }
 0x1e7   :  { %1271 = vmatprep.subr.bf16.mxu0 %v3208_v38  ;;  %v1044_v38 = vrot.slane %v1035_v26, %v3898_v11  ;;  %v3272_v26 = vld [vmem:[#allocation12 + $0x1c0] ss:$8 sps:$4 sm:$0xff]  }
 0x1e9   :  { %1527 = vmatpush1.bf16.msra.mxu1 %v3167_v13 }
 0x1ea   :  { %1528 = vmatprep.subr.bf16.mxu1 %v3175_v15  ;;  %1272 = vmatpush1.bf16.msra.mxu0 %v3206_v40 }
 0x1eb   :  { %1273 = vmatprep.subr.bf16.mxu0 %v3214_v42 }
 0x1ed   :  { %1529 = vmatpush1.bf16.msra.mxu1 %v3173_v17 }
 0x1ee   :  { %1530 = vmatprep.subr.bf16.mxu1 %v3181_v19  ;;  %1274 = vmatpush1.bf16.msra.mxu0 %v3212_v44 }
 0x1ef   :  { %1275 = vmatprep.subr.bf16.mxu0 %v3220_v46 }
 0x1f1   :  { %1531 = vmatpush1.bf16.msra.mxu1 %v3179_v21 }
 0x1f2   :  { %1532 = vmatprep.subr.bf16.mxu1 %v3187_v23  ;;  %1276 = vmatpush1.bf16.msra.mxu0 %v3218_v47  ;;  %v264_v23 = vand.u32 7, %v3892_v8 }
 0x1f3   :  { %1277 = vmatprep.subr.bf16.mxu0 %v3226_v50 }
 0x1f4   :  { %vm3927_vm3 = vcmp.eq.s32.totalorder %v264_v23, 0  ;;  %vm3931_vm4 = vcmp.eq.s32.totalorder %v264_v23, 7  ;;  %v3269_v23 = vld [vmem:[#allocation12 + $0x1b0] ss:$8 sps:$4 sm:$0xff]  }
 0x1f5   :  { %1533 = vmatpush1.bf16.msra.mxu1 %v3185_v25 }
 0x1f6   :  { %1534 = vmatprep.subr.bf16.mxu1 %v3193_v27  ;;  %1278 = vmatpush1.bf16.msra.mxu0 %v3224_v51 }
 0x1f7   :  { %1279 = vmatprep.subr.bf16.mxu0 %v3232_v54 }
 0x1f9   :  { %1535 = vmatpush1.bf16.msra.mxu1 %v3191_v29 }
 0x1fa   :  { %1536 = vmatprep.subr.bf16.mxu1 %v3199_v31  ;;  %1280 = vmatpush1.bf16.msra.mxu0 %v3230_v55 }
 0x1fb   :  { %1733 = vmatprep.subr.bf16.mxu0 %v3238_v58 }
 0x1fd   :  { %1537 = vmatpush1.bf16.msra.mxu1 %v3197_v33 }
 0x1fe   :  { %1538 = vmatprep.subr.bf16.mxu1 %v3205_v35  ;;  %v2571_v35 = vstv %s4070_s10 }
 0x201   :  { %1539 = vmatpush1.bf16.msra.mxu1 %v3203_v37 }
 0x202   :  { %1540 = vmatprep.subr.bf16.mxu1 %v3211_v39 }
 0x205   :  { %1541 = vmatpush1.bf16.msra.mxu1 %v3209_v41 }
 0x206   :  { %1542 = vmatprep.subr.bf16.mxu1 %v3217_v43 }
 0x209   :  { %1543 = vmatpush1.bf16.msra.mxu1 %v3215_v45 }
 0x20a   :  { %1544 = vmatprep.subr.bf16.mxu1 %v3223_v48 }
 0x20d   :  { %1545 = vmatpush1.bf16.msra.mxu1 %v3221_v49 }
 0x20e   :  { %1546 = vmatprep.subr.bf16.mxu1 %v3229_v52 }
 0x211   :  { %1547 = vmatpush1.bf16.msra.mxu1 %v3227_v53 }
 0x212   :  { %1548 = vmatprep.subr.bf16.mxu1 %v3235_v56 }
 0x215   :  { %1549 = vmatpush1.bf16.msra.mxu1 %v3233_v57 }
 0x26b   :  { %v516_v59 = vpop.f32.mrb[0].mxu1  ;;  %v785_v60 = vpop.f32.mrb[4].mxu0 }
 0x26c   :  { %v518_v61 = vpop.f32.mrb[1].mxu1  ;;  %v787_v62 = vpop.f32.mrb[5].mxu0  ;;  %v794_v1 = vrot.slane %v516_v59, 7  ;;  %v1014_v2 = vrot.slane %v785_v60, 1 }
 0x26d   :  { %v520_v63 = vpop.f32.mrb[2].mxu1  ;;  %v789_v0 = vpop.f32.mrb[6].mxu0  ;;  %v795_v7 = vrot.slane %v518_v61, 7  ;;  %v1015_v10 = vrot.slane %v787_v62, 1  ;;  %v3236_v62 = vld [vmem:[#allocation12 + $0x100] ss:$8 sps:$4 sm:$0xff]  }
 0x26e   :  { %v796_v3 = vrot.slane %v520_v63, 7  ;;  %v1016_v4 = vrot.slane %v789_v0, 1  ;;  %v522_v5 = vpop.f32.mrb[3].mxu1  ;;  %v791_v6 = vpop.f32.mrb[7].mxu0  ;;  %v3241_v63 = vld [vmem:[#allocation12 + $0x114] ss:$8 sps:$4 sm:$0xff]  }
 0x26f   :  { %v797_v12 = vrot.slane %v522_v5, 7  ;;  %v1017_v13 = vrot.slane %v791_v6, 1  ;;  %v3239_v0 = vld [vmem:[#allocation12 + $0x110] ss:$8 sps:$4 sm:$0xff]   ;;  %v3250_v5 = vld [vmem:[#allocation12 + $0x144] ss:$8 sps:$4 sm:$0xff]  }
 0x270   :  { %v801_v14 = vsel %vm798_vm1, %v796_v3, %v794_v1  ;;  %v1019_v15 = vsel %vm1018_vm2, %v1014_v2, %v1016_v4  ;;  %v799_v16 = vsel %vm798_vm1, %v794_v1, %v796_v3  ;;  %v1021_v17 = vsel %vm1018_vm2, %v1016_v4, %v1014_v2  ;;  %v3244_v1 = vld [vmem:[#allocation12 + $0x124] ss:$8 sps:$4 sm:$0xff]   ;;  %v3242_v2 = vld [vmem:[#allocation12 + $0x120] ss:$8 sps:$4 sm:$0xff]   ;;  %v3247_v3 = vld [vmem:[#allocation12 + $0x134] ss:$8 sps:$4 sm:$0xff]  }
 0x271   :  { %v802_v18 = vsel %vm798_vm1, %v797_v12, %v795_v7  ;;  %v1020_v19 = vsel %vm1018_vm2, %v1015_v10, %v1017_v13  ;;  %v800_v20 = vsel %vm798_vm1, %v795_v7, %v797_v12  ;;  %v1022_v21 = vsel %vm1018_vm2, %v1017_v13, %v1015_v10  ;;  %v3245_v4 = vld [vmem:[#allocation12 + $0x130] ss:$8 sps:$4 sm:$0xff]   ;;  %v3248_v6 = vld [vmem:[#allocation12 + $0x140] ss:$8 sps:$4 sm:$0xff]   ;;  %v3253_v7 = vld [vmem:[#allocation12 + $0x154] ss:$8 sps:$4 sm:$0xff]  }
 0x272   :  { %v807_v29 = vsel %vm3927_vm3, 0.0, %v801_v14  ;;  %v808_v33 = vsel %vm3927_vm3, 0.0, %v802_v18  ;;  %v1027_v36 = vsel %vm3931_vm4, 0.0, %v1019_v15  ;;  %v809_v39 = vsel %vm3935_vm5, 0.0, %v799_v16  ;;  %v3251_v10 = vld [vmem:[#allocation12 + $0x150] ss:$8 sps:$4 sm:$0xff]  }
 0x273   :  { %v1028_v42 = vsel %vm3931_vm4, 0.0, %v1020_v19  ;;  %v810_v44 = vsel %vm3935_vm5, 0.0, %v800_v20  ;;  %v1029_v47 = vsel %vm3944_vm6, 0.0, %v1021_v17  ;;  %v1030_v51 = vsel %vm3944_vm6, 0.0, %v1022_v21  ;;  %v3256_v12 = vld [vmem:[#allocation12 + $0x164] ss:$8 sps:$4 sm:$0xff]  }
 0x274   :  { %v3254_v13 = vld [vmem:[#allocation12 + $0x160] ss:$8 sps:$4 sm:$0xff]   ;;  %v3259_v14 = vld [vmem:[#allocation12 + $0x174] ss:$8 sps:$4 sm:$0xff]   ;;  %v3257_v15 = vld [vmem:[#allocation12 + $0x170] ss:$8 sps:$4 sm:$0xff]  }
 0x275   :  { %v3262_v16 = vld [vmem:[#allocation12 + $0x184] ss:$8 sps:$4 sm:$0xff]   ;;  %v3260_v17 = vld [vmem:[#allocation12 + $0x180] ss:$8 sps:$4 sm:$0xff]   ;;  %v3265_v18 = vld [vmem:[#allocation12 + $0x194] ss:$8 sps:$4 sm:$0xff]  }
 0x276   :  { %v3263_v19 = vld [vmem:[#allocation12 + $0x190] ss:$8 sps:$4 sm:$0xff]   ;;  %v3268_v20 = vld [vmem:[#allocation12 + $0x1a4] ss:$8 sps:$4 sm:$0xff]   ;;  %v3266_v21 = vld [vmem:[#allocation12 + $0x1a0] ss:$8 sps:$4 sm:$0xff]  }
 0x2ab   :  { %v1005_v30 = vpop.f32.mrb[4].mxu1 }
 0x2ac   :  { %v1006_v31 = vadd.f32 %v1005_v30, %v807_v29  ;;  %v1007_v34 = vpop.f32.mrb[5].mxu1  ;;  %v3277_v29 = vld [vmem:[#allocation12 + $0x1d4] ss:$8 sps:$4 sm:$0xff]   ;;  %v3275_v30 = vld [vmem:[#allocation12 + $0x1d0] ss:$8 sps:$4 sm:$0xff]  }
 0x2ad   :  { %v1008_v37 = vadd.f32 %v1007_v34, %v808_v33  ;;  %v1009_v40 = vpop.f32.mrb[6].mxu1  ;;  %v3283_v33 = vld [vmem:[#allocation12 + $0x1f4] ss:$8 sps:$4 sm:$0xff]   ;;  %v3281_v34 = vld [vmem:[#allocation12 + $0x1f0] ss:$8 sps:$4 sm:$0xff]  }
 0x2ae   :  { %v1031_v41 = vadd.f32 %v1027_v36, %v1006_v31  ;;  %v1010_v43 = vadd.f32 %v1009_v40, %v809_v39  ;;  %v1011_v45 = vpop.f32.mrb[7].mxu1  ;;  %v3280_v31 = vld [vmem:[#allocation12 + $0x1e4] ss:$8 sps:$4 sm:$0xff]   ;;  %v3292_v40 = vld [vmem:[#allocation15 + $0x14] ss:$8 sps:$4 sm:$0xff]  }
 0x2af   :  { %v1032_v46 = vadd.f32 %v1028_v42, %v1008_v37  ;;  %v1012_v48 = vadd.f32 %v1011_v45, %v810_v44  ;;  %v3284_v36 = vld [vmem:[#allocation15] ss:$8 sps:$4 sm:$0xff]   ;;  %v3286_v37 = vld [vmem:[#allocation15 + $0x4] ss:$8 sps:$4 sm:$0xff]   ;;  %v3290_v42 = vld [vmem:[#allocation15 + $0x10] ss:$8 sps:$4 sm:$0xff]  }
 0x2b0   :  { %v1047_v49 = vadd.f32 %v1040_v32, %v1031_v41  ;;  %v1033_v50 = vadd.f32 %v1029_v47, %v1010_v43  ;;  %v3289_v39 = vld [vmem:[#allocation15 + $0x204] ss:$8 sps:$4 sm:$0xff]   ;;  %2006 = vmatprep.subr.bf16.mxu1 %v3286_v37  ;;  %v3295_v41 = vld [vmem:[#allocation15 + $0x214] ss:$8 sps:$4 sm:$0xff]   ;;  %v3293_v43 = vld [vmem:[#allocation15 + $0x210] ss:$8 sps:$4 sm:$0xff]  }
 0x2b1   :  { %v1048_v52 = vadd.f32 %v1044_v38, %v1032_v46  ;;  %v1034_v53 = vadd.f32 %v1030_v51, %v1012_v48  ;;  %v3298_v44 = vld [vmem:[#allocation15 + $0x24] ss:$8 sps:$4 sm:$0xff]   ;;  %v3296_v46 = vld [vmem:[#allocation15 + $0x20] ss:$8 sps:$4 sm:$0xff]   ;;  %v3304_v48 = vld [vmem:[#allocation15 + $0x34] ss:$8 sps:$4 sm:$0xff]  }
 0x2b2   :  { %v1049_v54 = vadd.f32 %v1040_v32, %v1033_v50  ;;  %v1051_v56 = vmax.f32 %v1047_v49, 0.0  ;;  %v3278_v32 = vld [vmem:[#allocation12 + $0x1e0] ss:$8 sps:$4 sm:$0xff]   ;;  %v3302_v50 = vld [vmem:[#allocation15 + $0x30] ss:$8 sps:$4 sm:$0xff]  }
 0x2b3   :  { %v1050_v55 = vadd.f32 %v1044_v38, %v1034_v53  ;;  %v1052_v58 = vmax.f32 %v1048_v52, 0.0  ;;  %v3287_v38 = vld [vmem:[#allocation15 + $0x200] ss:$8 sps:$4 sm:$0xff]   ;;  %v3301_v45 = vld [vmem:[#allocation15 + $0x224] ss:$8 sps:$4 sm:$0xff]  }
 0x2b4   :  { %v1053_v57 = vmax.f32 %v1049_v54, 0.0  ;;  %v3299_v47 = vld [vmem:[#allocation15 + $0x220] ss:$8 sps:$4 sm:$0xff]   ;;  %v3307_v49 = vld [vmem:[#allocation15 + $0x234] ss:$8 sps:$4 sm:$0xff]  }
 0x2b5   :  { %v1054_v59 = vmax.f32 %v1050_v55, 0.0  ;;  %v3305_v51 = vld [vmem:[#allocation15 + $0x230] ss:$8 sps:$4 sm:$0xff]   ;;  %v3310_v52 = vld [vmem:[#allocation15 + $0x44] ss:$8 sps:$4 sm:$0xff]  }
 0x2b6   :  { %v3961_v60 = vpack.c.bf16 %v1053_v57, %v1051_v56  ;;  %v3313_v53 = vld [vmem:[#allocation15 + $0x244] ss:$8 sps:$4 sm:$0xff]   ;;  %v3308_v54 = vld [vmem:[#allocation15 + $0x40] ss:$8 sps:$4 sm:$0xff]   ;;  %v3316_v56 = vld [vmem:[#allocation15 + $0x54] ss:$8 sps:$4 sm:$0xff]  }
 0x2b7   :  { %v1056_v61 = vpack.c.bf16 %v1054_v59, %v1052_v58  ;;  %v3311_v55 = vld [vmem:[#allocation15 + $0x240] ss:$8 sps:$4 sm:$0xff]   ;;  %v3319_v57 = vld [vmem:[#allocation15 + $0x254] ss:$8 sps:$4 sm:$0xff]   ;;  %v3314_v58 = vld [vmem:[#allocation15 + $0x50] ss:$8 sps:$4 sm:$0xff]  }
 0x2b8   :  { %v3317_v59 = vld [vmem:[#allocation15 + $0x250] ss:$8 sps:$4 sm:$0xff]   ;;  %v3373_v37 = vld [vmem:[#allocation15 + $0x2e4] ss:$8 sps:$4 sm:$0xff]  }
 0x2b9   :  { %1281 = vmatprep.mubr.bf16.mxu0 %v1056_v61  ;;  %1550 = vmatprep.mubr.bf16.mxu1 %v1056_v61 }
 0x2ba   :  { %1282 = vmatmul.mubr.bf16.vlgmr.msra.gmra.mrb[8].mxu0 %v3961_v60  ;;  %1551 = vmatmul.mubr.bf16.vlgmr.msra.gmra.mrb[8].mxu1 %v3961_v60 }
 0x2bb   :  { %1734 = vmatpush1.bf16.msra.mxu0 %v3236_v62  ;;  %1765 = vmatprep.mubr.bf16.mxu0 %v1056_v61  ;;  %v3325_v61 = vld [vmem:[#allocation15 + $0x264] ss:$8 sps:$4 sm:$0xff]   ;;  %v3320_v62 = vld [vmem:[#allocation15 + $0x60] ss:$8 sps:$4 sm:$0xff]  }
 0x2bc   :  { %1735 = vmatprep.subr.bf16.mxu0 %v3241_v63  ;;  %2007 = vmatpush1.bf16.msra.mxu1 %v3284_v36  ;;  %v3323_v63 = vld [vmem:[#allocation15 + $0x260] ss:$8 sps:$4 sm:$0xff]  }
 0x2bd   :  { %2008 = vmatprep.subr.bf16.mxu1 %v3292_v40  ;;  %v3368_v36 = vld [vmem:[#allocation15 + $0xe0] ss:$8 sps:$4 sm:$0xff]   ;;  %v3374_v40 = vld [vmem:[#allocation15 + $0xf0] ss:$8 sps:$4 sm:$0xff]  }
 0x2bf   :  { %1736 = vmatpush1.bf16.msra.mxu0 %v3239_v0  ;;  %v3328_v0 = vld [vmem:[#allocation15 + $0x74] ss:$8 sps:$4 sm:$0xff]  }
 0x2c0   :  { %1737 = vmatprep.subr.bf16.mxu0 %v3244_v1  ;;  %2009 = vmatpush1.bf16.msra.mxu1 %v3290_v42  ;;  %v3331_v1 = vld [vmem:[#allocation15 + $0x274] ss:$8 sps:$4 sm:$0xff]   ;;  %v3377_v42 = vld [vmem:[#allocation15 + $0x2f0] ss:$8 sps:$4 sm:$0xff]  }
 0x2c1   :  { %2010 = vmatprep.subr.bf16.mxu1 %v3298_v44 }
 0x2c3   :  { %1738 = vmatpush1.bf16.msra.mxu0 %v3242_v2  ;;  %v3326_v2 = vld [vmem:[#allocation15 + $0x70] ss:$8 sps:$4 sm:$0xff]  }
 0x2c4   :  { %1739 = vmatprep.subr.bf16.mxu0 %v3247_v3  ;;  %2011 = vmatpush1.bf16.msra.mxu1 %v3296_v46  ;;  %v3329_v3 = vld [vmem:[#allocation15 + $0x270] ss:$8 sps:$4 sm:$0xff]  }
 0x2c5   :  { %2012 = vmatprep.subr.bf16.mxu1 %v3304_v48 }
 0x2c7   :  { %1740 = vmatpush1.bf16.msra.mxu0 %v3245_v4  ;;  %v3334_v4 = vld [vmem:[#allocation15 + $0x84] ss:$8 sps:$4 sm:$0xff]  }
 0x2c8   :  { %1741 = vmatprep.subr.bf16.mxu0 %v3250_v5  ;;  %2013 = vmatpush1.bf16.msra.mxu1 %v3302_v50  ;;  %v3337_v5 = vld [vmem:[#allocation15 + $0x284] ss:$8 sps:$4 sm:$0xff]  }
 0x2c9   :  { %2014 = vmatprep.subr.bf16.mxu1 %v3310_v52 }
 0x2cb   :  { %1742 = vmatpush1.bf16.msra.mxu0 %v3248_v6  ;;  %v3332_v6 = vld [vmem:[#allocation15 + $0x80] ss:$8 sps:$4 sm:$0xff]  }
 0x2cc   :  { %1743 = vmatprep.subr.bf16.mxu0 %v3253_v7  ;;  %2015 = vmatpush1.bf16.msra.mxu1 %v3308_v54  ;;  %v3335_v7 = vld [vmem:[#allocation15 + $0x280] ss:$8 sps:$4 sm:$0xff]  }
 0x2cd   :  { %2016 = vmatprep.subr.bf16.mxu1 %v3316_v56 }
 0x2cf   :  { %1744 = vmatpush1.bf16.msra.mxu0 %v3251_v10  ;;  %v3340_v10 = vld [vmem:[#allocation15 + $0x94] ss:$8 sps:$4 sm:$0xff]  }
 0x2d0   :  { %1745 = vmatprep.subr.bf16.mxu0 %v3256_v12  ;;  %2017 = vmatpush1.bf16.msra.mxu1 %v3314_v58  ;;  %v3343_v12 = vld [vmem:[#allocation15 + $0x294] ss:$8 sps:$4 sm:$0xff]  }
 0x2d3   :  { %1746 = vmatpush1.bf16.msra.mxu0 %v3254_v13  ;;  %v3338_v13 = vld [vmem:[#allocation15 + $0x90] ss:$8 sps:$4 sm:$0xff]  }
 0x2d4   :  { %1747 = vmatprep.subr.bf16.mxu0 %v3259_v14  ;;  %v3341_v14 = vld [vmem:[#allocation15 + $0x290] ss:$8 sps:$4 sm:$0xff]  }
 0x2d7   :  { %1748 = vmatpush1.bf16.msra.mxu0 %v3257_v15  ;;  %v3346_v15 = vld [vmem:[#allocation15 + $0xa4] ss:$8 sps:$4 sm:$0xff]  }
 0x2d8   :  { %1749 = vmatprep.subr.bf16.mxu0 %v3262_v16  ;;  %v3349_v16 = vld [vmem:[#allocation15 + $0x2a4] ss:$8 sps:$4 sm:$0xff]  }
 0x2db   :  { %1750 = vmatpush1.bf16.msra.mxu0 %v3260_v17  ;;  %v3344_v17 = vld [vmem:[#allocation15 + $0xa0] ss:$8 sps:$4 sm:$0xff]  }
 0x2dc   :  { %1751 = vmatprep.subr.bf16.mxu0 %v3265_v18  ;;  %v3347_v18 = vld [vmem:[#allocation15 + $0x2a0] ss:$8 sps:$4 sm:$0xff]  }
 0x2df   :  { %1752 = vmatpush1.bf16.msra.mxu0 %v3263_v19  ;;  %v3352_v19 = vld [vmem:[#allocation15 + $0xb4] ss:$8 sps:$4 sm:$0xff]  }
 0x2e0   :  { %1753 = vmatprep.subr.bf16.mxu0 %v3268_v20  ;;  %v3355_v20 = vld [vmem:[#allocation15 + $0x2b4] ss:$8 sps:$4 sm:$0xff]  }
 0x2e3   :  { %1754 = vmatpush1.bf16.msra.mxu0 %v3266_v21  ;;  %v3350_v21 = vld [vmem:[#allocation15 + $0xb0] ss:$8 sps:$4 sm:$0xff]  }
 0x2e4   :  { %1755 = vmatprep.subr.bf16.mxu0 %v3271_v22  ;;  %v3353_v22 = vld [vmem:[#allocation15 + $0x2b0] ss:$8 sps:$4 sm:$0xff]  }
 0x2e7   :  { %1756 = vmatpush1.bf16.msra.mxu0 %v3269_v23  ;;  %v3358_v23 = vld [vmem:[#allocation15 + $0xc4] ss:$8 sps:$4 sm:$0xff]  }
 0x2e8   :  { %1757 = vmatprep.subr.bf16.mxu0 %v3274_v24  ;;  %v3361_v24 = vld [vmem:[#allocation15 + $0x2c4] ss:$8 sps:$4 sm:$0xff]  }
 0x2eb   :  { %1758 = vmatpush1.bf16.msra.mxu0 %v3272_v26  ;;  %v3356_v26 = vld [vmem:[#allocation15 + $0xc0] ss:$8 sps:$4 sm:$0xff]  }
 0x2ec   :  { %1759 = vmatprep.subr.bf16.mxu0 %v3277_v29  ;;  %v3359_v29 = vld [vmem:[#allocation15 + $0x2c0] ss:$8 sps:$4 sm:$0xff]  }
 0x2ef   :  { %1760 = vmatpush1.bf16.msra.mxu0 %v3275_v30  ;;  %v3364_v30 = vld [vmem:[#allocation15 + $0xd4] ss:$8 sps:$4 sm:$0xff]  }
 0x2f0   :  { %1761 = vmatprep.subr.bf16.mxu0 %v3280_v31  ;;  %v3362_v31 = vld [vmem:[#allocation15 + $0xd0] ss:$8 sps:$4 sm:$0xff]  }
 0x2f3   :  { %1762 = vmatpush1.bf16.msra.mxu0 %v3278_v32  ;;  %v3367_v32 = vld [vmem:[#allocation15 + $0x2d4] ss:$8 sps:$4 sm:$0xff]  }
 0x2f4   :  { %1763 = vmatprep.subr.bf16.mxu0 %v3283_v33  ;;  %v3365_v33 = vld [vmem:[#allocation15 + $0x2d0] ss:$8 sps:$4 sm:$0xff]  }
 0x2f7   :  { %1764 = vmatpush1.bf16.msra.mxu0 %v3281_v34  ;;  %v3370_v34 = vld [vmem:[#allocation15 + $0xe4] ss:$8 sps:$4 sm:$0xff]  }
 0x2f8   :  { %2275 = vmatprep.subr.bf16.mxu0 %v3289_v39  ;;  %v3376_v39 = vld [vmem:[#allocation15 + $0xf4] ss:$8 sps:$4 sm:$0xff]  }
 0x2fa   :  { %1766 = vmatmul.mubr.bf16.vlgmr.msra.gmra.mrb[12].mxu0 %v3961_v60  ;;  %v3322_v60 = vld [vmem:[#allocation15 + $0x64] ss:$8 sps:$4 sm:$0xff]  }
 0x2fb   :  { %2276 = vmatpush1.bf16.msra.mxu0 %v3287_v38  ;;  %2018 = vmatprep.subr.bf16.mxu1 %v3322_v60  ;;  %v3371_v38 = vld [vmem:[#allocation15 + $0x2e0] ss:$8 sps:$4 sm:$0xff]  }
 0x2fc   :  { %2277 = vmatprep.subr.bf16.mxu0 %v3295_v41  ;;  %2019 = vmatpush1.bf16.msra.mxu1 %v3320_v62  ;;  %v3379_v41 = vld [vmem:[#allocation15 + $0x2f4] ss:$8 sps:$4 sm:$0xff]  }
 0x2fd   :  { %2020 = vmatprep.subr.bf16.mxu1 %v3328_v0 }
 0x2ff   :  { %2278 = vmatpush1.bf16.msra.mxu0 %v3293_v43  ;;  %v3382_v43 = vld [vmem:[#allocation15 + $0x104] ss:$8 sps:$4 sm:$0xff]  }
 0x300   :  { %2279 = vmatprep.subr.bf16.mxu0 %v3301_v45  ;;  %2021 = vmatpush1.bf16.msra.mxu1 %v3326_v2 }
 0x301   :  { %2022 = vmatprep.subr.bf16.mxu1 %v3334_v4  ;;  %v1792_v4 = vld [vmem:[#allocation14] sm:$0x3] }
 0x303   :  { %2280 = vmatpush1.bf16.msra.mxu0 %v3299_v47 }
 0x304   :  { %2281 = vmatprep.subr.bf16.mxu0 %v3307_v49  ;;  %2023 = vmatpush1.bf16.msra.mxu1 %v3332_v6 }
 0x305   :  { %2024 = vmatprep.subr.bf16.mxu1 %v3340_v10  ;;  %v1797_v10 = vrot.slane %v1792_v4, %v3895_v9 }
 0x307   :  { %2282 = vmatpush1.bf16.msra.mxu0 %v3305_v51 }
 0x308   :  { %2283 = vmatprep.subr.bf16.mxu0 %v3313_v53  ;;  %2025 = vmatpush1.bf16.msra.mxu1 %v3338_v13 }
 0x309   :  { %2026 = vmatprep.subr.bf16.mxu1 %v3346_v15 }
 0x30b   :  { %2284 = vmatpush1.bf16.msra.mxu0 %v3311_v55 }
 0x30c   :  { %2285 = vmatprep.subr.bf16.mxu0 %v3319_v57  ;;  %2027 = vmatpush1.bf16.msra.mxu1 %v3344_v17 }
 0x30d   :  { %2028 = vmatprep.subr.bf16.mxu1 %v3352_v19 }
 0x30f   :  { %2286 = vmatpush1.bf16.msra.mxu0 %v3317_v59 }
 0x310   :  { %2287 = vmatprep.subr.bf16.mxu0 %v3325_v61  ;;  %2029 = vmatpush1.bf16.msra.mxu1 %v3350_v21 }
 0x311   :  { %2030 = vmatprep.subr.bf16.mxu1 %v3358_v23 }
 0x313   :  { %2288 = vmatpush1.bf16.msra.mxu0 %v3323_v63 }
 0x314   :  { %2289 = vmatprep.subr.bf16.mxu0 %v3331_v1  ;;  %2031 = vmatpush1.bf16.msra.mxu1 %v3356_v26 }
 0x315   :  { %2032 = vmatprep.subr.bf16.mxu1 %v3364_v30 }
 0x317   :  { %2290 = vmatpush1.bf16.msra.mxu0 %v3329_v3 }
 0x318   :  { %2291 = vmatprep.subr.bf16.mxu0 %v3337_v5  ;;  %2033 = vmatpush1.bf16.msra.mxu1 %v3362_v31 }
 0x319   :  { %2034 = vmatprep.subr.bf16.mxu1 %v3370_v34 }
 0x31b   :  { %2292 = vmatpush1.bf16.msra.mxu0 %v3335_v7 }
 0x31c   :  { %2293 = vmatprep.subr.bf16.mxu0 %v3343_v12  ;;  %2035 = vmatpush1.bf16.msra.mxu1 %v3368_v36 }
 0x31d   :  { %2036 = vmatprep.subr.bf16.mxu1 %v3376_v39 }
 0x31f   :  { %2294 = vmatpush1.bf16.msra.mxu0 %v3341_v14 }
 0x320   :  { %2295 = vmatprep.subr.bf16.mxu0 %v3349_v16  ;;  %2037 = vmatpush1.bf16.msra.mxu1 %v3374_v40  ;;  %v1801_v16 = vrot.slane %v1792_v4, %v3898_v11  ;;  %v3416_v4 = vld [vmem:[#allocation15 + $0x1c0] ss:$8 sps:$4 sm:$0xff]  }
 0x321   :  { %2490 = vmatprep.subr.bf16.mxu1 %v3382_v43 }
 0x323   :  { %2296 = vmatpush1.bf16.msra.mxu0 %v3347_v18 }
 0x324   :  { %2297 = vmatprep.subr.bf16.mxu0 %v3355_v20 }
 0x327   :  { %2298 = vmatpush1.bf16.msra.mxu0 %v3353_v22 }
 0x328   :  { %2299 = vmatprep.subr.bf16.mxu0 %v3361_v24 }
 0x32b   :  { %2300 = vmatpush1.bf16.msra.mxu0 %v3359_v29 }
 0x32c   :  { %2301 = vmatprep.subr.bf16.mxu0 %v3367_v32 }
 0x32f   :  { %2302 = vmatpush1.bf16.msra.mxu0 %v3365_v33 }
 0x330   :  { %2303 = vmatprep.subr.bf16.mxu0 %v3373_v37 }
 0x333   :  { %2304 = vmatpush1.bf16.msra.mxu0 %v3371_v38 }
 0x334   :  { %2305 = vmatprep.subr.bf16.mxu0 %v3379_v41 }
 0x337   :  { %2306 = vmatpush1.bf16.msra.mxu0 %v3377_v42 }
 0x38d   :  { %v1283_v44 = vpop.f32.mrb[8].mxu0  ;;  %v1552_v45 = vpop.f32.mrb[8].mxu1 }
 0x38e   :  { %v1285_v46 = vpop.f32.mrb[9].mxu0  ;;  %v1554_v47 = vpop.f32.mrb[9].mxu1  ;;  %v1561_v50 = vrot.slane %v1283_v44, 7  ;;  %v1776_v51 = vrot.slane %v1552_v45, 1  ;;  %v3380_v44 = vld [vmem:[#allocation15 + $0x100] ss:$8 sps:$4 sm:$0xff]  }
 0x38f   :  { %v1287_v48 = vpop.f32.mrb[10].mxu0  ;;  %v1556_v49 = vpop.f32.mrb[10].mxu1  ;;  %v1562_v56 = vrot.slane %v1285_v46, 7  ;;  %v1777_v57 = vrot.slane %v1554_v47, 1  ;;  %v3385_v45 = vld [vmem:[#allocation15 + $0x114] ss:$8 sps:$4 sm:$0xff]  }
 0x390   :  { %v1563_v52 = vrot.slane %v1287_v48, 7  ;;  %v1778_v53 = vrot.slane %v1556_v49, 1  ;;  %v1289_v54 = vpop.f32.mrb[11].mxu0  ;;  %v1558_v55 = vpop.f32.mrb[11].mxu1  ;;  %v3383_v46 = vld [vmem:[#allocation15 + $0x110] ss:$8 sps:$4 sm:$0xff]  }
 0x391   :  { %v1564_v58 = vrot.slane %v1289_v54, 7  ;;  %v1779_v59 = vrot.slane %v1558_v55, 1  ;;  %v3388_v47 = vld [vmem:[#allocation15 + $0x124] ss:$8 sps:$4 sm:$0xff]   ;;  %v3386_v48 = vld [vmem:[#allocation15 + $0x120] ss:$8 sps:$4 sm:$0xff]  }
 0x392   :  { %v1567_v60 = vsel %vm798_vm1, %v1563_v52, %v1561_v50  ;;  %v1780_v61 = vsel %vm1018_vm2, %v1776_v51, %v1778_v53  ;;  %v1565_v62 = vsel %vm798_vm1, %v1561_v50, %v1563_v52  ;;  %v1782_v63 = vsel %vm1018_vm2, %v1778_v53, %v1776_v51  ;;  %v3391_v49 = vld [vmem:[#allocation15 + $0x134] ss:$8 sps:$4 sm:$0xff]   ;;  %v3389_v50 = vld [vmem:[#allocation15 + $0x130] ss:$8 sps:$4 sm:$0xff]   ;;  %v3394_v51 = vld [vmem:[#allocation15 + $0x144] ss:$8 sps:$4 sm:$0xff]  }
 0x393   :  { %v1568_v0 = vsel %vm798_vm1, %v1564_v58, %v1562_v56  ;;  %v1781_v1 = vsel %vm1018_vm2, %v1777_v57, %v1779_v59  ;;  %v1566_v2 = vsel %vm798_vm1, %v1562_v56, %v1564_v58  ;;  %v1783_v3 = vsel %vm1018_vm2, %v1779_v59, %v1777_v57  ;;  %v3392_v52 = vld [vmem:[#allocation15 + $0x140] ss:$8 sps:$4 sm:$0xff]   ;;  %v3397_v53 = vld [vmem:[#allocation15 + $0x154] ss:$8 sps:$4 sm:$0xff]   ;;  %v3395_v54 = vld [vmem:[#allocation15 + $0x150] ss:$8 sps:$4 sm:$0xff]  }
 0x394   :  { %v1569_v5 = vsel %vm3927_vm3, 0.0, %v1567_v60  ;;  %v1570_v12 = vsel %vm3927_vm3, 0.0, %v1568_v0  ;;  %v1784_v14 = vsel %vm3931_vm4, 0.0, %v1780_v61  ;;  %v1571_v17 = vsel %vm3935_vm5, 0.0, %v1565_v62  ;;  %v3400_v55 = vld [vmem:[#allocation15 + $0x164] ss:$8 sps:$4 sm:$0xff]  }
 0x395   :  { %v1785_v20 = vsel %vm3931_vm4, 0.0, %v1781_v1  ;;  %v1572_v22 = vsel %vm3935_vm5, 0.0, %v1566_v2  ;;  %v1786_v26 = vsel %vm3944_vm6, 0.0, %v1782_v63  ;;  %v1787_v32 = vsel %vm3944_vm6, 0.0, %v1783_v3  ;;  %v3398_v56 = vld [vmem:[#allocation15 + $0x160] ss:$8 sps:$4 sm:$0xff]  }
 0x396   :  { %v3403_v57 = vld [vmem:[#allocation15 + $0x174] ss:$8 sps:$4 sm:$0xff]   ;;  %v3401_v58 = vld [vmem:[#allocation15 + $0x170] ss:$8 sps:$4 sm:$0xff]   ;;  %v3406_v59 = vld [vmem:[#allocation15 + $0x184] ss:$8 sps:$4 sm:$0xff]  }
 0x397   :  { %v3404_v60 = vld [vmem:[#allocation15 + $0x180] ss:$8 sps:$4 sm:$0xff]   ;;  %v3409_v61 = vld [vmem:[#allocation15 + $0x194] ss:$8 sps:$4 sm:$0xff]   ;;  %v3407_v62 = vld [vmem:[#allocation15 + $0x190] ss:$8 sps:$4 sm:$0xff]  }
 0x398   :  { %v3412_v63 = vld [vmem:[#allocation15 + $0x1a4] ss:$8 sps:$4 sm:$0xff]   ;;  %v3410_v0 = vld [vmem:[#allocation15 + $0x1a0] ss:$8 sps:$4 sm:$0xff]   ;;  %v3415_v1 = vld [vmem:[#allocation15 + $0x1b4] ss:$8 sps:$4 sm:$0xff]  }
 0x399   :  { %v3413_v2 = vld [vmem:[#allocation15 + $0x1b0] ss:$8 sps:$4 sm:$0xff]   ;;  %v3418_v3 = vld [vmem:[#allocation15 + $0x1c4] ss:$8 sps:$4 sm:$0xff]  }
 0x3cd   :  { %v1767_v6 = vpop.f32.mrb[12].mxu0 }
 0x3ce   :  { %v1768_v7 = vadd.f32 %v1767_v6, %v1569_v5  ;;  %v1769_v13 = vpop.f32.mrb[13].mxu0  ;;  %v3421_v5 = vld [vmem:[#allocation15 + $0x1d4] ss:$8 sps:$4 sm:$0xff]   ;;  %v3419_v6 = vld [vmem:[#allocation15 + $0x1d0] ss:$8 sps:$4 sm:$0xff]  }
 0x3cf   :  { %v1770_v15 = vadd.f32 %v1769_v13, %v1570_v12  ;;  %v1771_v18 = vpop.f32.mrb[14].mxu0  ;;  %v3427_v12 = vld [vmem:[#allocation15 + $0x1f4] ss:$8 sps:$4 sm:$0xff]   ;;  %v3425_v13 = vld [vmem:[#allocation15 + $0x1f0] ss:$8 sps:$4 sm:$0xff]  }
 0x3d0   :  { %v1788_v19 = vadd.f32 %v1784_v14, %v1768_v7  ;;  %v1772_v21 = vadd.f32 %v1771_v18, %v1571_v17  ;;  %v1773_v23 = vpop.f32.mrb[15].mxu0  ;;  %v3424_v7 = vld [vmem:[#allocation15 + $0x1e4] ss:$8 sps:$4 sm:$0xff]   ;;  %v4005_v14 = vld [vmem:[#allocation18] sm:$0x3] }
 0x3d1   :  { %v1789_v24 = vadd.f32 %v1785_v20, %v1770_v15  ;;  %v1774_v29 = vadd.f32 %v1773_v23, %v1572_v22  ;;  %v2580_v15 = vrot.slane %v4005_v14, %v3898_v11 }
 0x3d2   :  { %v1804_v30 = vadd.f32 %v1797_v10, %v1788_v19  ;;  %v1790_v31 = vadd.f32 %v1786_v26, %v1772_v21 }
 0x3d3   :  { %v1805_v33 = vadd.f32 %v1801_v16, %v1789_v24  ;;  %v1791_v34 = vadd.f32 %v1787_v32, %v1774_v29 }
 0x3d4   :  { %v1806_v36 = vadd.f32 %v1797_v10, %v1790_v31  ;;  %v1808_v38 = vmax.f32 %v1804_v30, 0.0  ;;  %v3422_v10 = vld [vmem:[#allocation15 + $0x1e0] ss:$8 sps:$4 sm:$0xff]  }
 0x3d5   :  { %v1807_v37 = vadd.f32 %v1801_v16, %v1791_v34  ;;  %v1809_v40 = vmax.f32 %v1805_v33, 0.0 }
 0x3d6   :  { %v1810_v39 = vmax.f32 %v1806_v36, 0.0 }
 0x3d7   :  { %v1811_v41 = vmax.f32 %v1807_v37, 0.0 }
 0x3d8   :  { %v4000_v42 = vpack.c.bf16 %v1810_v39, %v1808_v38 }
 0x3d9   :  { %v1813_v43 = vpack.c.bf16 %v1811_v41, %v1809_v40 }
 0x3db   :  { %2038 = vmatprep.mubr.bf16.mxu1 %v1813_v43  ;;  %2307 = vmatprep.mubr.bf16.mxu0 %v1813_v43 }
 0x3dc   :  { %2039 = vmatmul.mubr.bf16.vlgmr.msra.gmra.mrb[12].mxu1 %v4000_v42  ;;  %2308 = vmatmul.mubr.bf16.vlgmr.msra.gmra.mrb[16].mxu0 %v4000_v42 }
 0x3dd   :  { %2491 = vmatpush1.bf16.msra.mxu1 %v3380_v44  ;;  %2522 = vmatprep.mubr.bf16.mxu1 %v1813_v43  ;;  %v2549_v44 = vld [vmem:[#allocation17] sm:$0x3] }
 0x3de   :  { %2492 = vmatprep.subr.bf16.mxu1 %v3385_v45  ;;  %2647 = vmatprep.mubr.f32.mxu0 %v2580_v15 }
 0x3e1   :  { %2493 = vmatpush1.bf16.msra.mxu1 %v3383_v46 }
 0x3e2   :  { %2494 = vmatprep.subr.bf16.mxu1 %v3388_v47 }
 0x3e5   :  { %2495 = vmatpush1.bf16.msra.mxu1 %v3386_v48  ;;  %v2554_v48 = vrot.slane %v2549_v44, %v3895_v9 }
 0x3e6   :  { %2496 = vmatprep.subr.bf16.mxu1 %v3391_v49 }
 0x3e9   :  { %2497 = vmatpush1.bf16.msra.mxu1 %v3389_v50 }
 0x3ea   :  { %2498 = vmatprep.subr.bf16.mxu1 %v3394_v51 }
 0x3ed   :  { %2499 = vmatpush1.bf16.msra.mxu1 %v3392_v52 }
 0x3ee   :  { %2500 = vmatprep.subr.bf16.mxu1 %v3397_v53  ;;  %v2558_v53 = vrot.slane %v2549_v44, %v3898_v11 }
 0x3f1   :  { %2501 = vmatpush1.bf16.msra.mxu1 %v3395_v54 }
 0x3f2   :  { %2502 = vmatprep.subr.bf16.mxu1 %v3400_v55 }
 0x3f5   :  { %2503 = vmatpush1.bf16.msra.mxu1 %v3398_v56 }
 0x3f6   :  { %2504 = vmatprep.subr.bf16.mxu1 %v3403_v57 }
 0x3f9   :  { %2505 = vmatpush1.bf16.msra.mxu1 %v3401_v58 }
 0x3fa   :  { %2506 = vmatprep.subr.bf16.mxu1 %v3406_v59 }
 0x3fd   :  { %2507 = vmatpush1.bf16.msra.mxu1 %v3404_v60 }
 0x3fe   :  { %2508 = vmatprep.subr.bf16.mxu1 %v3409_v61 }
 0x401   :  { %2509 = vmatpush1.bf16.msra.mxu1 %v3407_v62 }
 0x402   :  { %2510 = vmatprep.subr.bf16.mxu1 %v3412_v63 }
 0x405   :  { %2511 = vmatpush1.bf16.msra.mxu1 %v3410_v0 }
 0x406   :  { %2512 = vmatprep.subr.bf16.mxu1 %v3415_v1 }
 0x409   :  { %2513 = vmatpush1.bf16.msra.mxu1 %v3413_v2 }
 0x40a   :  { %2514 = vmatprep.subr.bf16.mxu1 %v3418_v3 }
 0x40d   :  { %2515 = vmatpush1.bf16.msra.mxu1 %v3416_v4 }
 0x40e   :  { %2516 = vmatprep.subr.bf16.mxu1 %v3421_v5 }
 0x411   :  { %2517 = vmatpush1.bf16.msra.mxu1 %v3419_v6 }
 0x412   :  { %2518 = vmatprep.subr.bf16.mxu1 %v3424_v7 }
 0x415   :  { %2519 = vmatpush1.bf16.msra.mxu1 %v3422_v10  ;;  %v2576_v10 = vrot.slane %v4005_v14, %v3895_v9 }
 0x416   :  { %2520 = vmatprep.subr.bf16.mxu1 %v3427_v12 }
 0x419   :  { %2521 = vmatpush1.bf16.msra.mxu1 %v3425_v13 }
 0x41c   :  { %2523 = vmatmul.mubr.bf16.vlgmr.msra.gmra.mrb[16].mxu1 %v4000_v42 }
 0x4af   :  { %v2040_v16 = vpop.f32.mrb[12].mxu1  ;;  %v2309_v17 = vpop.f32.mrb[16].mxu0 }
 0x4b0   :  { %v2042_v18 = vpop.f32.mrb[13].mxu1  ;;  %v2311_v19 = vpop.f32.mrb[17].mxu0  ;;  %v2318_v22 = vrot.slane %v2040_v16, 7  ;;  %v2533_v23 = vrot.slane %v2309_v17, 1 }
 0x4b1   :  { %v2044_v20 = vpop.f32.mrb[14].mxu1  ;;  %v2313_v21 = vpop.f32.mrb[18].mxu0  ;;  %v2319_v31 = vrot.slane %v2042_v18, 7  ;;  %v2534_v32 = vrot.slane %v2311_v19, 1 }
 0x4b2   :  { %v2320_v24 = vrot.slane %v2044_v20, 7  ;;  %v2535_v26 = vrot.slane %v2313_v21, 1  ;;  %v2046_v29 = vpop.f32.mrb[15].mxu1  ;;  %v2315_v30 = vpop.f32.mrb[19].mxu0 }
 0x4b3   :  { %v2321_v33 = vrot.slane %v2046_v29, 7  ;;  %v2536_v34 = vrot.slane %v2315_v30, 1 }
 0x4b4   :  { %v2324_v36 = vsel %vm798_vm1, %v2320_v24, %v2318_v22  ;;  %v2537_v37 = vsel %vm1018_vm2, %v2533_v23, %v2535_v26  ;;  %v2322_v38 = vsel %vm798_vm1, %v2318_v22, %v2320_v24  ;;  %v2539_v39 = vsel %vm1018_vm2, %v2535_v26, %v2533_v23 }
 0x4b5   :  { %v2325_v40 = vsel %vm798_vm1, %v2321_v33, %v2319_v31  ;;  %v2538_v41 = vsel %vm1018_vm2, %v2534_v32, %v2536_v34  ;;  %v2323_v42 = vsel %vm798_vm1, %v2319_v31, %v2321_v33  ;;  %v2540_v43 = vsel %vm1018_vm2, %v2536_v34, %v2534_v32 }
 0x4b6   :  { %v2326_v45 = vsel %vm3927_vm3, 0.0, %v2324_v36  ;;  %v2327_v49 = vsel %vm3927_vm3, 0.0, %v2325_v40  ;;  %v2541_v51 = vsel %vm3931_vm4, 0.0, %v2537_v37  ;;  %v2328_v8 = vsel %vm3935_vm5, 0.0, %v2322_v38 }
 0x4b7   :  { %v2542_v56 = vsel %vm3931_vm4, 0.0, %v2538_v41  ;;  %v2329_v25 = vsel %vm3935_vm5, 0.0, %v2323_v42  ;;  %v2543_v60 = vsel %vm3944_vm6, 0.0, %v2539_v39  ;;  %v2544_v63 = vsel %vm3944_vm6, 0.0, %v2540_v43 }
 0x4ef   :  { %v2524_v46 = vpop.f32.mrb[16].mxu1 }
 0x4f0   :  { %v2525_v47 = vadd.f32 %v2524_v46, %v2326_v45  ;;  %v2526_v50 = vpop.f32.mrb[17].mxu1 }
 0x4f1   :  { %v2527_v52 = vadd.f32 %v2526_v50, %v2327_v49  ;;  %v2528_v54 = vpop.f32.mrb[18].mxu1 }
 0x4f2   :  { %v2545_v55 = vadd.f32 %v2541_v51, %v2525_v47  ;;  %v2529_v57 = vadd.f32 %v2528_v54, %v2328_v8  ;;  %v2530_v58 = vpop.f32.mrb[19].mxu1 }
 0x4f3   :  { %v2546_v59 = vadd.f32 %v2542_v56, %v2527_v52  ;;  %v2531_v61 = vadd.f32 %v2530_v58, %v2329_v25 }
 0x4f4   :  { %v2561_v62 = vadd.f32 %v2554_v48, %v2545_v55  ;;  %v2547_v11 = vadd.f32 %v2543_v60, %v2529_v57 }
 0x4f5   :  { %v2562_v0 = vadd.f32 %v2558_v53, %v2546_v59  ;;  %v2548_v1 = vadd.f32 %v2544_v63, %v2531_v61 }
 0x4f6   :  { %v2563_v2 = vadd.f32 %v2554_v48, %v2547_v11  ;;  %v2565_v3 = vmax.f32 %v2561_v62, 0.0 }
 0x4f7   :  { %v2564_v27 = vadd.f32 %v2558_v53, %v2548_v1  ;;  %v2566_v5 = vmax.f32 %v2562_v0, 0.0 }
 0x4f8   :  { %v2567_v4 = vmax.f32 %v2563_v2, 0.0 }
 0x4f9   :  { %v2568_v28 = vmax.f32 %v2564_v27, 0.0 }
 0x4fa   :  { %v2971_v6 = vpack.c.bf16 %v2567_v4, %v2565_v3 }
 0x4fb   :  { %v2969_v7 = vpack.c.bf16 %v2568_v28, %v2566_v5 }
 0x4fd   :  { %2970 = vmatprep.subr.bf16.mxu0 %v2969_v7 }
 0x4fe   :  { %2972 = vmatpush1.bf16.xpose.msra.mxu0 %v2971_v6 }
 0x505   :  { %2648 = vmatmul.mubr.f32.vlgmr.msra.gmra.mrb[20].mxu0 %v2576_v10 }
 0x5d8   :  { %v2649_v12 = vpop.f32.mrb[20].mxu0 }
 0x5d9   :  { %v2650_v13 = vadd.f32 %v2649_v12, %v2571_v35  ;;  %v2651_v15 = vpop.f32.mrb[21].mxu0 }
 0x5db   :  { %2654 = vst.msk [vmem:[#allocation20] sm:$0x1] %vm2653_vm7, %v2650_v13 }
 0x5dc   :  { %3659 = shalt.err (!%p3656_p0)
}
 0x5dd   :  { %s3660_s10 = scalar_lea.hbm %s4071_s11, 16 }
 0x5de   :  { %p3661_p1 = scmp.ne.s32.totalorder %s4071_s11, %s3660_s10  ;;  %p3664_p2 = scmp.lt.u32.totalorder %s3660_s10, %s4071_s11 }
 0x5e0   :  { %p3666_p3 = pnand %p3664_p2, %p3661_p1 }
 0x5e2   :  { %3669 = shalt.err (!%p3666_p3)
}
 0x5e3   :  { %2664 = dma.vmem_to_hbm [thread:$0]  %s2662_s12, 16, %s4071_s11, [#allocation5]  }
 0x5e4   :  { %3682 = dma.done.wait [#allocation5], 16  }
 0x5e5   :  { %3683 = vsyncadd [#allocation5], 4294967280 }
 0x5e6   :  { %2668 = vsyncpa [#allocation4], 1 }
 0x5e7   :  { %2669 = vsyncpa [#allocation7], 1 }
 0x5e8   :  { %2670 = vsyncpa [#allocation10], 1 }
 0x5e9   :  { %2671 = vsyncpa [#allocation13], 1 }
 0x5ea   :  { %2672 = vsyncpa [#allocation16], 1 }
 0x5eb   :  { %2673 = vsyncpa [#allocation19], 1 }
 0x5ec   :  { %2674 = vsyncpa [#allocation5], 1 }

</bundles_post_ra>
